<compile_context>
chip_gen: v7x
topology: tpu7x:2x2x1
jax: 0.10.0
libtpu: 0.0.40
codegen_flags: <defaults>
</compile_context>

<pallas_src>
import functools
import math

import jax
import jax.numpy as jnp
from jax.experimental import pallas as pl
from jax.experimental.pallas import tpu as pltpu


_VMEM_LIMIT = 48 * 1024 * 1024  # headroom under v7x's 64 MiB physical VMEM

# TODO(synk): for v6e/v7x a further ~2x on matmul-bound parts is available by
# casting MXU operands to bf16 (keep f32 accumulation); kept f32 here to
# preserve the reference module's numerics.


def _pick_tile(dim, candidates):
    """Largest candidate that evenly divides `dim`; otherwise the full dim."""
    for c in candidates:
        if c < dim and dim % c == 0:
            return c
    return dim


_M_TILES = (512, 256, 128, 64, 32, 16, 8)   # sublane-aligned
_NK_TILES = (512, 256, 128)                 # lane-aligned (128 multiples)


# ----------------------------------------------------------------------------
# Tiled linear (+ optional fused activation)
# ----------------------------------------------------------------------------
def _apply_act(y, act):
    if act == "relu":
        return jnp.maximum(y, 0.0)
    if act == "tanh":
        return jnp.tanh(y)
    if act == "gelu":
        # TODO(synk): reference BERT uses erf-GELU; tanh approximation used here.
        return 0.5 * y * (1.0 + jnp.tanh(0.7978845608028654 *
                                         (y + 0.044715 * y * y * y)))
    return y


def _linear_kernel(x_ref, w_ref, b_ref, o_ref, acc_ref, *, act):
    @pl.when(pl.program_id(2) == 0)
    def _():
        acc_ref[...] = jnp.zeros_like(acc_ref)

    acc_ref[...] += jnp.dot(x_ref[...], w_ref[...],
                            preferred_element_type=jnp.float32)

    @pl.when(pl.program_id(2) == pl.num_programs(2) - 1)
    def _():
        y = acc_ref[...] + b_ref[...]
        o_ref[...] = _apply_act(y, act).astype(o_ref.dtype)


def linear(x, w, b, act="none"):
    """x: (M, K) @ w: (K, N) + b: (N,) with optional fused activation."""
    M, K = x.shape
    N = w.shape[1]
    TM = _pick_tile(M, _M_TILES)
    TN = _pick_tile(N, _NK_TILES)
    TK = _pick_tile(K, _NK_TILES)
    return pl.pallas_call(
        functools.partial(_linear_kernel, act=act),
        out_shape=jax.ShapeDtypeStruct((M, N), x.dtype),
        grid=(M // TM, N // TN, K // TK),
        in_specs=[
            pl.BlockSpec((TM, TK), lambda i, j, k: (i, k)),
            pl.BlockSpec((TK, TN), lambda i, j, k: (k, j)),
            pl.BlockSpec((1, TN), lambda i, j, k: (0, j)),
        ],
        out_specs=pl.BlockSpec((TM, TN), lambda i, j, k: (i, j)),
        scratch_shapes=[pltpu.VMEM((TM, TN), jnp.float32)],
        compiler_params=pltpu.CompilerParams(
            dimension_semantics=("parallel", "parallel", "arbitrary"),
            vmem_limit_bytes=_VMEM_LIMIT),
    )(x, w, b.reshape(1, N))


# ----------------------------------------------------------------------------
# Tiled linear with fused residual-add + LayerNorm epilogue
# ----------------------------------------------------------------------------
def _linear_add_ln_kernel(x_ref, w_ref, b_ref, r_ref, g_ref, bb_ref,
                          o_ref, acc_ref, *, eps):
    @pl.when(pl.program_id(1) == 0)
    def _():
        acc_ref[...] = jnp.zeros_like(acc_ref)

    acc_ref[...] += jnp.dot(x_ref[...], w_ref[...],
                            preferred_element_type=jnp.float32)

    @pl.when(pl.program_id(1) == pl.num_programs(1) - 1)
    def _():
        y = acc_ref[...] + b_ref[...] + r_ref[...]
        mu = jnp.mean(y, axis=-1, keepdims=True)
        yc = y - mu
        var = jnp.mean(yc * yc, axis=-1, keepdims=True)
        o_ref[...] = ((yc * jax.lax.rsqrt(var + eps)) * g_ref[...]
                      + bb_ref[...]).astype(o_ref.dtype)


def linear_add_ln(x, w, b, resid, gamma, beta, eps=1e-12):
    """LayerNorm(x @ w + b + resid); N (= H) stays whole so LN can fuse."""
    M, K = x.shape
    N = w.shape[1]
    TM = _pick_tile(M, _M_TILES)
    TK = _pick_tile(K, _NK_TILES)
    return pl.pallas_call(
        functools.partial(_linear_add_ln_kernel, eps=eps),
        out_shape=jax.ShapeDtypeStruct((M, N), x.dtype),
        grid=(M // TM, K // TK),
        in_specs=[
            pl.BlockSpec((TM, TK), lambda i, k: (i, k)),
            pl.BlockSpec((TK, N), lambda i, k: (k, 0)),
            pl.BlockSpec((1, N), lambda i, k: (0, 0)),
            pl.BlockSpec((TM, N), lambda i, k: (i, 0)),
            pl.BlockSpec((1, N), lambda i, k: (0, 0)),
            pl.BlockSpec((1, N), lambda i, k: (0, 0)),
        ],
        out_specs=pl.BlockSpec((TM, N), lambda i, k: (i, 0)),
        scratch_shapes=[pltpu.VMEM((TM, N), jnp.float32)],
        compiler_params=pltpu.CompilerParams(
            dimension_semantics=("parallel", "arbitrary"),
            vmem_limit_bytes=_VMEM_LIMIT),
    )(x, w, b.reshape(1, N), resid, gamma.reshape(1, N), beta.reshape(1, N))


# ----------------------------------------------------------------------------
# Plain LayerNorm (embedding LN — no residual, no zeros DMA)
# ----------------------------------------------------------------------------
def _ln_kernel(x_ref, g_ref, b_ref, o_ref, *, eps):
    x = x_ref[...]
    mu = jnp.mean(x, axis=-1, keepdims=True)
    xc = x - mu
    var = jnp.mean(xc * xc, axis=-1, keepdims=True)
    o_ref[...] = ((xc * jax.lax.rsqrt(var + eps)) * g_ref[...]
                  + b_ref[...]).astype(o_ref.dtype)


def layernorm(x, gamma, beta, eps=1e-12):
    M, H = x.shape
    TM = _pick_tile(M, (1024,) + _M_TILES)
    return pl.pallas_call(
        functools.partial(_ln_kernel, eps=eps),
        out_shape=jax.ShapeDtypeStruct((M, H), x.dtype),
        grid=(M // TM,),
        in_specs=[
            pl.BlockSpec((TM, H), lambda i: (i, 0)),
            pl.BlockSpec((1, H), lambda i: (0, 0)),
            pl.BlockSpec((1, H), lambda i: (0, 0)),
        ],
        out_specs=pl.BlockSpec((TM, H), lambda i: (i, 0)),
        compiler_params=pltpu.CompilerParams(
            dimension_semantics=("parallel",), vmem_limit_bytes=_VMEM_LIMIT),
    )(x, gamma.reshape(1, H), beta.reshape(1, H))


# ----------------------------------------------------------------------------
# Multi-head self-attention: one grid step per batch element, all heads per
# step, reading the fused (B, S, 3H) QKV tensor directly (no glue transposes).
# ----------------------------------------------------------------------------
def _mha_kernel(qkv_ref, m_ref, o_ref, *, nh, d, scale):
    H = nh * d
    m = m_ref[0]                      # (1, S) additive mask, broadcasts over rows
    outs = []
    for h in range(nh):
        q = qkv_ref[0, :, h * d:(h + 1) * d]              # (S, d)
        k = qkv_ref[0, :, H + h * d:H + (h + 1) * d]      # (S, d)
        v = qkv_ref[0, :, 2 * H + h * d:2 * H + (h + 1) * d]
        s = jax.lax.dot_general(q, k, (((1,), (1,)), ((), ())),
                                preferred_element_type=jnp.float32)
        s = s * scale + m
        s = s - jnp.max(s, axis=-1, keepdims=True)
        p = jnp.exp(s)
        p = p * pl.reciprocal(jnp.sum(p, axis=-1, keepdims=True), approx=True)
        outs.append(jnp.dot(p, v, preferred_element_type=jnp.float32))
    # single lane-dense store of the full (S, H) context
    o_ref[0] = jnp.concatenate(outs, axis=-1).astype(o_ref.dtype)


def multihead_attention(qkv, add_mask, nh, d):
    """qkv: (B, S, 3H); add_mask: (B, 1, S) additive mask; returns (B, S, H)."""
    B, S, H3 = qkv.shape
    H = nh * d
    return pl.pallas_call(
        functools.partial(_mha_kernel, nh=nh, d=d, scale=1.0 / math.sqrt(d)),
        out_shape=jax.ShapeDtypeStruct((B, S, H), qkv.dtype),
        grid=(B,),
        in_specs=[
            pl.BlockSpec((1, S, H3), lambda b: (b, 0, 0)),
            pl.BlockSpec((1, 1, S), lambda b: (b, 0, 0)),
        ],
        out_specs=pl.BlockSpec((1, S, H), lambda b: (b, 0, 0)),
        compiler_params=pltpu.CompilerParams(
            dimension_semantics=("parallel",), vmem_limit_bytes=_VMEM_LIMIT),
    )(qkv, add_mask)


# ----------------------------------------------------------------------------
# Fused pooling head: BERT pooler (first-token Linear+tanh) + attention pool +
# mean + max + combine Linear+tanh — one Pallas launch, tiled over batch,
# lane-dense (1, 1, H) output, no (B, 4H) concat ever hitting HBM.
# ----------------------------------------------------------------------------
def _pool_combine_kernel(x_ref, m_ref, aw_ref, ab_ref, pw_ref, pb_ref,
                         cw_ref, cb_ref, o_ref, *, H):
    x = x_ref[0]                      # (S, H)
    mask = m_ref[0]                   # (S, 1) float

    # --- AttentionLayer pooling ---
    logits = jnp.dot(x, aw_ref[...],
                     preferred_element_type=jnp.float32) + ab_ref[...]   # (S, 1)
    # NOTE: reference subtracts a global (whole-batch) max; after the masked
    # normalization the constant cancels exactly, so per-example max is
    # mathematically identical and at least as stable.
    e = jnp.exp(logits - jnp.max(logits, keepdims=True)) * mask          # (S, 1)
    w = e * pl.reciprocal(jnp.sum(e, keepdims=True), approx=True)        # (S, 1)
    att = jax.lax.dot_general(w, x, (((0,), (0,)), ((), ())),
                              preferred_element_type=jnp.float32)        # (1, H)

    # --- BERT pooler: tanh(Linear(first token)) ---
    pooled = jnp.tanh(jnp.dot(x[0:1, :], pw_ref[...],
                              preferred_element_type=jnp.float32)
                      + pb_ref[...])                                     # (1, H)

    # --- mean / max over the sequence (unmasked, matching the reference) ---
    mean = jnp.mean(x, axis=0, keepdims=True)                            # (1, H)
    mx = jnp.max(x, axis=0, keepdims=True)                               # (1, H)

    # --- combine: tanh(cat(att, pooled, mean, max) @ Wc + bc), Wc sliced ---
    y = (jnp.dot(att,    cw_ref[0 * H:1 * H, :], preferred_element_type=jnp.float32)
         + jnp.dot(pooled, cw_ref[1 * H:2 * H, :], preferred_element_type=jnp.float32)
         + jnp.dot(mean,   cw_ref[2 * H:3 * H, :], preferred_element_type=jnp.float32)
         + jnp.dot(mx,     cw_ref[3 * H:4 * H, :], preferred_element_type=jnp.float32)
         + cb_ref[...])
    o_ref[0] = jnp.tanh(y).astype(o_ref.dtype)


def pool_and_combine(seq_out, mask_f, p):
    """seq_out: (B, S, H); mask_f: (B, S) float; returns combined pooled (B, H)."""
    B, S, H = seq_out.shape
    out = pl.pallas_call(
        functools.partial(_pool_combine_kernel, H=H),
        out_shape=jax.ShapeDtypeStruct((B, 1, H), seq_out.dtype),
        grid=(B,),
        in_specs=[
            pl.BlockSpec((1, S, H), lambda b: (b, 0, 0)),
            pl.BlockSpec((1, S, 1), lambda b: (b, 0, 0)),
            pl.BlockSpec((H, 1), lambda b: (0, 0)),
            pl.BlockSpec((1, 1), lambda b: (0, 0)),
            pl.BlockSpec((H, H), lambda b: (0, 0)),
            pl.BlockSpec((1, H), lambda b: (0, 0)),
            pl.BlockSpec((4 * H, H), lambda b: (0, 0)),
            pl.BlockSpec((1, H), lambda b: (0, 0)),
        ],
        out_specs=pl.BlockSpec((1, 1, H), lambda b: (b, 0, 0)),
        compiler_params=pltpu.CompilerParams(
            dimension_semantics=("parallel",), vmem_limit_bytes=_VMEM_LIMIT),
    )(seq_out, mask_f.reshape(B, S, 1),
      p["attn_w"].reshape(H, 1), p["attn_b"].reshape(1, 1),
      p["pool_w"], p["pool_b"].reshape(1, H),
      p["comb_w"], p["comb_b"].reshape(1, H))
    return out[:, 0, :]


# ----------------------------------------------------------------------------
# Fused classifier + ranknet heads (single launch on the tiny pooled features)
# ----------------------------------------------------------------------------
def _heads_kernel(x_ref, c1w, c1b, c2w, c2b, c3w, c3b, r1w, r1b, r2w, r2b,
                  logits_ref, scores_ref):
    x = x_ref[...]
    # ClassifierWithBCELoss: relu(fc1) -> relu(fc2) -> fc3
    h = jnp.maximum(jnp.dot(x, c1w[...], preferred_element_type=jnp.float32)
                    + c1b[...], 0.0)
    h = jnp.maximum(jnp.dot(h, c2w[...], preferred_element_type=jnp.float32)
                    + c2b[...], 0.0)
    logits_ref[...] = (jnp.dot(h, c3w[...], preferred_element_type=jnp.float32)
                       + c3b[...]).astype(logits_ref.dtype)
    # ListNet: tanh(fc1) -> fc2
    t = jnp.tanh(jnp.dot(x, r1w[...], preferred_element_type=jnp.float32)
                 + r1b[...])
    scores_ref[...] = (jnp.dot(t, r2w[...], preferred_element_type=jnp.float32)
                       + r2b[...]).astype(scores_ref.dtype)


def classifier_ranknet_heads(pooled, p):
    B, H = pooled.shape
    C = p["c_fc3_w"].shape[1]
    args = [pooled,
            p["c_fc1_w"], p["c_fc1_b"].reshape(1, -1),
            p["c_fc2_w"], p["c_fc2_b"].reshape(1, -1),
            p["c_fc3_w"], p["c_fc3_b"].reshape(1, -1),
            p["r_fc1_w"], p["r_fc1_b"].reshape(1, -1),
            p["r_fc2_w"], p["r_fc2_b"].reshape(1, -1)]

    def full_spec(a):
        nd = a.ndim
        return pl.BlockSpec(a.shape, lambda i, _nd=nd: (0,) * _nd)

    out_spec = pl.BlockSpec((B, C), lambda i: (0, 0))
    return pl.pallas_call(
        _heads_kernel,
        out_shape=(jax.ShapeDtypeStruct((B, C), pooled.dtype),
                   jax.ShapeDtypeStruct((B, C), pooled.dtype)),
        grid=(1,),
        in_specs=[full_spec(a) for a in args],
        out_specs=(out_spec, out_spec),
        compiler_params=pltpu.CompilerParams(
            dimension_semantics=("arbitrary",), vmem_limit_bytes=_VMEM_LIMIT),
    )(*args)


# ----------------------------------------------------------------------------
# Parameter initialization (deterministic, BERT-style N(0, 0.02))
# ----------------------------------------------------------------------------
def _lin_init(key, d_in, d_out):
    return (0.02 * jax.random.normal(key, (d_in, d_out), jnp.float32),
            jnp.zeros((d_out,), jnp.float32))


def init_params(key, cfg):
    H, I, L = cfg["hidden"], cfg["inter"], cfg["layers"]
    V, P, C = cfg["vocab"], cfg["max_pos"], cfg["num_labels"]
    ks = iter(jax.random.split(key, 64))
    p = {}
    p["word_emb"] = 0.02 * jax.random.normal(next(ks), (V, H), jnp.float32)
    p["pos_emb"] = 0.02 * jax.random.normal(next(ks), (P, H), jnp.float32)
    p["tok_emb"] = 0.02 * jax.random.normal(next(ks), (2, H), jnp.float32)
    p["emb_ln_g"] = jnp.ones((H,), jnp.float32)
    p["emb_ln_b"] = jnp.zeros((H,), jnp.float32)

    layers = []
    for _ in range(L):
        lp = {}
        lp["qkv_w"], lp["qkv_b"] = _lin_init(next(ks), H, 3 * H)   # fused Q|K|V
        lp["ao_w"], lp["ao_b"] = _lin_init(next(ks), H, H)
        lp["ao_ln_g"], lp["ao_ln_b"] = jnp.ones((H,)), jnp.zeros((H,))
        lp["i_w"], lp["i_b"] = _lin_init(next(ks), H, I)
        lp["o_w"], lp["o_b"] = _lin_init(next(ks), I, H)
        lp["o_ln_g"], lp["o_ln_b"] = jnp.ones((H,)), jnp.zeros((H,))
        layers.append(lp)
    p["layers"] = layers

    p["pool_w"], p["pool_b"] = _lin_init(next(ks), H, H)               # BERT pooler
    p["attn_w"] = 0.02 * jax.random.normal(next(ks), (H,), jnp.float32)  # Linear(H,1)
    p["attn_b"] = jnp.zeros((1,), jnp.float32)
    p["comb_w"], p["comb_b"] = _lin_init(next(ks), 4 * H, H)           # combine

    p["c_fc1_w"], p["c_fc1_b"] = _lin_init(next(ks), H, H)             # classifier
    p["c_fc2_w"], p["c_fc2_b"] = _lin_init(next(ks), H, H)
    p["c_fc3_w"], p["c_fc3_b"] = _lin_init(next(ks), H, C)
    p["r_fc1_w"], p["r_fc1_b"] = _lin_init(next(ks), H, H)             # ranknet
    p["r_fc2_w"], p["r_fc2_b"] = _lin_init(next(ks), H, C)
    return p


# ----------------------------------------------------------------------------
# Model forward (plain-JAX glue calling Pallas kernels)
# ----------------------------------------------------------------------------
def bert_layer(x_flat, add_mask, lp, cfg, B, S):
    H, nh = cfg["hidden"], cfg["heads"]
    d = H // nh

    qkv = linear(x_flat, lp["qkv_w"], lp["qkv_b"])                 # (B*S, 3H)
    ctx = multihead_attention(qkv.reshape(B, S, 3 * H), add_mask, nh, d)
    ctx = ctx.reshape(B * S, H)

    # attention output proj + residual + LayerNorm fused
    x1 = linear_add_ln(ctx, lp["ao_w"], lp["ao_b"],
                       x_flat, lp["ao_ln_g"], lp["ao_ln_b"])
    # FFN
    inter = linear(x1, lp["i_w"], lp["i_b"], act="gelu")
    x2 = linear_add_ln(inter, lp["o_w"], lp["o_b"],
                       x1, lp["o_ln_g"], lp["o_ln_b"])
    return x2


def attention_bert_forward(p, input_ids, token_type_ids, attention_mask, cfg):
    B, S = input_ids.shape
    H = cfg["hidden"]

    # ----- embeddings (lookups are glue; LayerNorm in Pallas; dropout=identity) --
    pos_ids = jnp.arange(S)
    emb = (p["word_emb"][input_ids]
           + p["pos_emb"][pos_ids][None, :, :]
           + p["tok_emb"][token_type_ids])
    x_flat = layernorm(emb.reshape(B * S, H), p["emb_ln_g"], p["emb_ln_b"])

    # extended attention mask: (1 - mask) * -10000, kept at (B, 1, S)
    mask_f = attention_mask.astype(jnp.float32)
    add_mask = ((1.0 - mask_f) * -10000.0).reshape(B, 1, S)

    # ----- encoder -----
    for lp in p["layers"]:
        x_flat = bert_layer(x_flat, add_mask, lp, cfg, B, S)
    sequence_output = x_flat.reshape(B, S, H)

    # ----- pooler + attention-pool + mean + max + combine, fully fused -----
    pooled_output = pool_and_combine(sequence_output, mask_f, p)
    return pooled_output


def classification_model_forward(p, input_ids, token_type_ids=None,
                                 attention_mask=None, cfg=None):
    if attention_mask is None:
        attention_mask = jnp.ones_like(input_ids)
    if token_type_ids is None:
        token_type_ids = jnp.zeros_like(input_ids)

    pooled_output = attention_bert_forward(p, input_ids, token_type_ids,
                                           attention_mask, cfg)
    # self.dropout: identity in eval mode (no labels -> inference path).

    # classifier (relu/relu/fc3) + ranknet (tanh/fc2) fused into one kernel
    logits, scores = classifier_ranknet_heads(pooled_output, p)
    return logits, scores


# ----------------------------------------------------------------------------
if __name__ == "__main__":
    cfg = dict(vocab=100, hidden=32, heads=4, layers=2, inter=64,
               max_pos=16, num_labels=6)
    B, S = 2, 8

    key = jax.random.PRNGKey(0)
    k_param, k_ids = jax.random.split(key)
    params = init_params(k_param, cfg)

    input_ids = jax.random.randint(k_ids, (B, S), 0, cfg["vocab"], dtype=jnp.int32)
    token_type_ids = jnp.zeros((B, S), jnp.int32)
    attention_mask = jnp.ones((B, S), jnp.int32).at[1, 6:].set(0)  # pad last 2 of ex.1

    fwd = jax.jit(lambda p, ids, tt, am:
                  classification_model_forward(p, ids, tt, am, cfg=cfg))
    logits, scores = fwd(params, input_ids, token_type_ids, attention_mask)
    jax.block_until_ready((logits, scores))

    assert logits.shape == (B, cfg["num_labels"])
    assert scores.shape == (B, cfg["num_labels"])
    assert bool(jnp.all(jnp.isfinite(logits))) and bool(jnp.all(jnp.isfinite(scores)))
    print("KERNEL_OK")
</pallas_src>

<mosaic_0001>
module attributes {stable_mosaic.version = 11 : i64} {
  func.func @_ln_kernel(%arg0: i32, %arg1: memref<8x32xf32, #tpu.memory_space<vmem>>, %arg2: memref<1x32xf32, #tpu.memory_space<vmem>>, %arg3: memref<1x32xf32, #tpu.memory_space<vmem>>, %arg4: memref<8x32xf32, #tpu.memory_space<vmem>>) attributes {dimension_semantics = [#tpu.dimension_semantics<parallel>], iteration_bounds = array<i64: 2>, scalar_prefetch = 0 : i64, scratch_operands = 0 : i64, tpu.core_type = #tpu.core_type<tc>, window_params = [{transform_indices = @transform_0, window_bounds = array<i64: 8, 32>}, {pipeline_mode = #tpu.pipeline_mode<synchronous>, transform_indices = @transform_1, window_bounds = array<i64: 1, 32>}, {pipeline_mode = #tpu.pipeline_mode<synchronous>, transform_indices = @transform_2, window_bounds = array<i64: 1, 32>}, {transform_indices = @transform_3, window_bounds = array<i64: 8, 32>}]} {
    %c0 = arith.constant 0 : index
    %c0_0 = arith.constant 0 : index
    %0 = vector.load %arg1[%c0, %c0_0] : memref<8x32xf32, #tpu.memory_space<vmem>>, vector<8x32xf32>
    %cst = arith.constant dense<0.000000e+00> : vector<8xf32>
    %1 = vector.multi_reduction <add>, %0, %cst [1] : vector<8x32xf32> to vector<8xf32>
    %2 = vector.shape_cast %1 : vector<8xf32> to vector<8x1xf32>
    %cst_1 = arith.constant 3.200000e+01 : f32
    %3 = vector.broadcast %cst_1 : f32 to vector<8x1xf32>
    %4 = arith.divf %2, %3 : vector<8x1xf32>
    %5 = vector.broadcast %4 : vector<8x1xf32> to vector<8x32xf32>
    %6 = arith.subf %0, %5 : vector<8x32xf32>
    %7 = arith.mulf %6, %6 : vector<8x32xf32>
    %cst_2 = arith.constant dense<0.000000e+00> : vector<8xf32>
    %8 = vector.multi_reduction <add>, %7, %cst_2 [1] : vector<8x32xf32> to vector<8xf32>
    %9 = vector.shape_cast %8 : vector<8xf32> to vector<8x1xf32>
    %cst_3 = arith.constant 3.200000e+01 : f32
    %10 = vector.broadcast %cst_3 : f32 to vector<8x1xf32>
    %11 = arith.divf %9, %10 : vector<8x1xf32>
    %cst_4 = arith.constant 9.99999996E-13 : f32
    %12 = vector.broadcast %cst_4 : f32 to vector<8x1xf32>
    %13 = arith.addf %11, %12 : vector<8x1xf32>
    %14 = math.rsqrt %13 : vector<8x1xf32>
    %15 = vector.broadcast %14 : vector<8x1xf32> to vector<8x32xf32>
    %16 = arith.mulf %6, %15 : vector<8x32xf32>
    %c0_5 = arith.constant 0 : index
    %c0_6 = arith.constant 0 : index
    %17 = vector.load %arg2[%c0_5, %c0_6] : memref<1x32xf32, #tpu.memory_space<vmem>>, vector<1x32xf32>
    %18 = vector.broadcast %17 : vector<1x32xf32> to vector<8x32xf32>
    %19 = arith.mulf %16, %18 : vector<8x32xf32>
    %c0_7 = arith.constant 0 : index
    %c0_8 = arith.constant 0 : index
    %20 = vector.load %arg3[%c0_7, %c0_8] : memref<1x32xf32, #tpu.memory_space<vmem>>, vector<1x32xf32>
    %21 = vector.broadcast %20 : vector<1x32xf32> to vector<8x32xf32>
    %22 = arith.addf %19, %21 : vector<8x32xf32>
    %c0_9 = arith.constant 0 : index
    %c0_10 = arith.constant 0 : index
    %23 = vector.load %arg4[%c0_9, %c0_10] : memref<8x32xf32, #tpu.memory_space<vmem>>, vector<8x32xf32>
    tpu.vector_store %arg4[%c0_9, %c0_10], %22 {strides = array<i32>} : memref<8x32xf32, #tpu.memory_space<vmem>>, vector<8x32xf32>,
    return
  }
  func.func @transform_0(%arg0: i32) -> (i32, i32) {
    %c0_i32 = arith.constant 0 : i32
    %c0_i32_0 = arith.constant 0 : i32
    return %arg0, %c0_i32 : i32, i32
  }
  func.func @transform_1(%arg0: i32) -> (i32, i32) {
    %c0_i32 = arith.constant 0 : i32
    %c0_i32_0 = arith.constant 0 : i32
    %c0_i32_1 = arith.constant 0 : i32
    return %c0_i32, %c0_i32_0 : i32, i32
  }
  func.func @transform_2(%arg0: i32) -> (i32, i32) {
    %c0_i32 = arith.constant 0 : i32
    %c0_i32_0 = arith.constant 0 : i32
    %c0_i32_1 = arith.constant 0 : i32
    return %c0_i32, %c0_i32_0 : i32, i32
  }
  func.func @transform_3(%arg0: i32) -> (i32, i32) {
    %c0_i32 = arith.constant 0 : i32
    %c0_i32_0 = arith.constant 0 : i32
    return %arg0, %c0_i32 : i32, i32
  }
}

module attributes {stable_mosaic.version = 11 : i64} {
  func.func @_linear_kernel(%arg0: i32, %arg1: i32, %arg2: i32, %arg3: memref<8x32xf32, #tpu.memory_space<vmem>>, %arg4: memref<32x96xf32, #tpu.memory_space<vmem>>, %arg5: memref<1x96xf32, #tpu.memory_space<vmem>>, %arg6: memref<8x96xf32, #tpu.memory_space<vmem>>, %arg7: memref<8x96xf32, #tpu.memory_space<vmem>>) attributes {dimension_semantics = [#tpu.dimension_semantics<parallel>, #tpu.dimension_semantics<parallel>, #tpu.dimension_semantics<arbitrary>], iteration_bounds = array<i64: 2, 1, 1>, scalar_prefetch = 0 : i64, scratch_operands = 1 : i64, tpu.core_type = #tpu.core_type<tc>, window_params = [{transform_indices = @transform_0, window_bounds = array<i64: 8, 32>}, {transform_indices = @transform_1, window_bounds = array<i64: 32, 96>}, {transform_indices = @transform_2, window_bounds = array<i64: 1, 96>}, {transform_indices = @transform_3, window_bounds = array<i64: 8, 96>}]} {
    %c0_i32 = arith.constant 0 : i32
    %0 = arith.cmpi eq, %arg2, %c0_i32 : i32
    %1 = arith.extui %0 : i1 to i32
    %c0_i32_0 = arith.constant 0 : i32
    %2 = arith.cmpi ne, %1, %c0_i32_0 : i32
    scf.if %2 {
      %cst_10 = arith.constant 0.000000e+00 : f32
      %12 = vector.broadcast %cst_10 : f32 to vector<8x96xf32>
      %c0_11 = arith.constant 0 : index
      %c0_12 = arith.constant 0 : index
      %13 = vector.load %arg7[%c0_11, %c0_12] : memref<8x96xf32, #tpu.memory_space<vmem>>, vector<8x96xf32>
      tpu.vector_store %arg7[%c0_11, %c0_12], %12 {strides = array<i32>} : memref<8x96xf32, #tpu.memory_space<vmem>>, vector<8x96xf32>,
    } else {
    }
    %c0 = arith.constant 0 : index
    %c0_1 = arith.constant 0 : index
    %3 = vector.load %arg7[%c0, %c0_1] : memref<8x96xf32, #tpu.memory_space<vmem>>, vector<8x96xf32>
    %c0_2 = arith.constant 0 : index
    %c0_3 = arith.constant 0 : index
    %4 = vector.load %arg3[%c0_2, %c0_3] : memref<8x32xf32, #tpu.memory_space<vmem>>, vector<8x32xf32>
    %c0_4 = arith.constant 0 : index
    %c0_5 = arith.constant 0 : index
    %5 = vector.load %arg4[%c0_4, %c0_5] : memref<32x96xf32, #tpu.memory_space<vmem>>, vector<32x96xf32>
    %cst = arith.constant dense<0.000000e+00> : vector<8x96xf32>
    %6 = tpu.matmul %4, %5, %cst {dimension_numbers = #tpu.dot_dimension_numbers<[1], [0], [0], [1], [0, 0, 1, 1], [], []>} : vector<8x32xf32>, vector<32x96xf32>, vector<8x96xf32> -> vector<8x96xf32>
    %7 = arith.addf %3, %6 : vector<8x96xf32>
    %c0_6 = arith.constant 0 : index
    %c0_7 = arith.constant 0 : index
    %8 = vector.load %arg7[%c0_6, %c0_7] : memref<8x96xf32, #tpu.memory_space<vmem>>, vector<8x96xf32>
    tpu.vector_store %arg7[%c0_6, %c0_7], %7 {strides = array<i32>} : memref<8x96xf32, #tpu.memory_space<vmem>>, vector<8x96xf32>,
    %c0_i32_8 = arith.constant 0 : i32
    %9 = arith.cmpi eq, %arg2, %c0_i32_8 : i32
    %10 = arith.extui %9 : i1 to i32
    %c0_i32_9 = arith.constant 0 : i32
    %11 = arith.cmpi ne, %10, %c0_i32_9 : i32
    scf.if %11 {
      %c0_10 = arith.constant 0 : index
      %c0_11 = arith.constant 0 : index
      %12 = vector.load %arg7[%c0_10, %c0_11] : memref<8x96xf32, #tpu.memory_space<vmem>>, vector<8x96xf32>
      %c0_12 = arith.constant 0 : index
      %c0_13 = arith.constant 0 : index
      %13 = vector.load %arg5[%c0_12, %c0_13] : memref<1x96xf32, #tpu.memory_space<vmem>>, vector<1x96xf32>
      %14 = vector.broadcast %13 : vector<1x96xf32> to vector<8x96xf32>
      %15 = arith.addf %12, %14 : vector<8x96xf32>
      %c0_14 = arith.constant 0 : index
      %c0_15 = arith.constant 0 : index
      %16 = vector.load %arg6[%c0_14, %c0_15] : memref<8x96xf32, #tpu.memory_space<vmem>>, vector<8x96xf32>
      tpu.vector_store %arg6[%c0_14, %c0_15], %15 {strides = array<i32>} : memref<8x96xf32, #tpu.memory_space<vmem>>, vector<8x96xf32>,
    } else {
    }
    return
  }
  func.func @transform_0(%arg0: i32, %arg1: i32, %arg2: i32) -> (i32, i32) {
    %c0_i32 = arith.constant 0 : i32
    return %arg0, %arg2 : i32, i32
  }
  func.func @transform_1(%arg0: i32, %arg1: i32, %arg2: i32) -> (i32, i32) {
    %c0_i32 = arith.constant 0 : i32
    return %arg2, %arg1 : i32, i32
  }
  func.func @transform_2(%arg0: i32, %arg1: i32, %arg2: i32) -> (i32, i32) {
    %c0_i32 = arith.constant 0 : i32
    %c0_i32_0 = arith.constant 0 : i32
    return %c0_i32, %arg1 : i32, i32
  }
  func.func @transform_3(%arg0: i32, %arg1: i32, %arg2: i32) -> (i32, i32) {
    %c0_i32 = arith.constant 0 : i32
    return %arg0, %arg1 : i32, i32
  }
}

module attributes {stable_mosaic.version = 11 : i64} {
  func.func @_mha_kernel(%arg0: i32, %arg1: memref<1x8x96xf32, #tpu.memory_space<vmem>>, %arg2: memref<1x1x8xf32, #tpu.memory_space<vmem>>, %arg3: memref<1x8x32xf32, #tpu.memory_space<vmem>>) attributes {dimension_semantics = [#tpu.dimension_semantics<parallel>], iteration_bounds = array<i64: 2>, scalar_prefetch = 0 : i64, scratch_operands = 0 : i64, tpu.core_type = #tpu.core_type<tc>, window_params = [{transform_indices = @transform_0, window_bounds = array<i64: 1, 8, 96>}, {transform_indices = @transform_1, window_bounds = array<i64: 1, 1, 8>}, {transform_indices = @transform_2, window_bounds = array<i64: 1, 8, 32>}]} {
    %c0 = arith.constant 0 : index
    %c0_0 = arith.constant 0 : index
    %c0_1 = arith.constant 0 : index
    %0 = vector.load %arg2[%c0, %c0_0, %c0_1] : memref<1x1x8xf32, #tpu.memory_space<vmem>>, vector<1x1x8xf32>
    %1 = vector.shape_cast %0 : vector<1x1x8xf32> to vector<1x8xf32>
    %c0_2 = arith.constant 0 : index
    %c0_3 = arith.constant 0 : index
    %c0_4 = arith.constant 0 : index
    %2 = vector.load %arg1[%c0_2, %c0_3, %c0_4] : memref<1x8x96xf32, #tpu.memory_space<vmem>>, vector<1x8x8xf32>
    %3 = vector.shape_cast %2 : vector<1x8x8xf32> to vector<8x8xf32>
    %c0_5 = arith.constant 0 : index
    %c0_6 = arith.constant 0 : index
    %c32 = arith.constant 32 : index
    %4 = vector.load %arg1[%c0_5, %c0_6, %c32] : memref<1x8x96xf32, #tpu.memory_space<vmem>>, vector<1x8x8xf32>
    %5 = vector.shape_cast %4 : vector<1x8x8xf32> to vector<8x8xf32>
    %c0_7 = arith.constant 0 : index
    %c0_8 = arith.constant 0 : index
    %c64 = arith.constant 64 : index
    %6 = vector.load %arg1[%c0_7, %c0_8, %c64] : memref<1x8x96xf32, #tpu.memory_space<vmem>>, vector<1x8x8xf32>
    %7 = vector.shape_cast %6 : vector<1x8x8xf32> to vector<8x8xf32>
    %cst = arith.constant dense<0.000000e+00> : vector<8x8xf32>
    %8 = tpu.matmul %3, %5, %cst {dimension_numbers = #tpu.dot_dimension_numbers<[1], [1], [0], [0], [0, 0, 1, 0], [], []>} : vector<8x8xf32>, vector<8x8xf32>, vector<8x8xf32> -> vector<8x8xf32>
    %cst_9 = arith.constant 0.353553385 : f32
    %9 = vector.broadcast %cst_9 : f32 to vector<8x8xf32>
    %10 = arith.mulf %8, %9 : vector<8x8xf32>
    %11 = vector.broadcast %1 : vector<1x8xf32> to vector<8x8xf32>
    %12 = arith.addf %10, %11 : vector<8x8xf32>
    %cst_10 = arith.constant dense<0xFF800000> : vector<8xf32>
    %13 = vector.multi_reduction <maximumf>, %12, %cst_10 [1] : vector<8x8xf32> to vector<8xf32>
    %14 = vector.shape_cast %13 : vector<8xf32> to vector<8x1xf32>
    %15 = vector.broadcast %14 : vector<8x1xf32> to vector<8x8xf32>
    %16 = arith.subf %12, %15 : vector<8x8xf32>
    %17 = math.exp %16 : vector<8x8xf32>
    %cst_11 = arith.constant dense<0.000000e+00> : vector<8xf32>
    %18 = vector.multi_reduction <add>, %17, %cst_11 [1] : vector<8x8xf32> to vector<8xf32>
    %19 = vector.shape_cast %18 : vector<8xf32> to vector<8x1xf32>
    %20 = tpu.reciprocal %19 {approx = true} : vector<8x1xf32> -> vector<8x1xf32>
    %21 = vector.broadcast %20 : vector<8x1xf32> to vector<8x8xf32>
    %22 = arith.mulf %17, %21 : vector<8x8xf32>
    %cst_12 = arith.constant dense<0.000000e+00> : vector<8x8xf32>
    %23 = tpu.matmul %22, %7, %cst_12 {dimension_numbers = #tpu.dot_dimension_numbers<[1], [0], [0], [1], [0, 0, 1, 1], [], []>} : vector<8x8xf32>, vector<8x8xf32>, vector<8x8xf32> -> vector<8x8xf32>
    %c0_13 = arith.constant 0 : index
    %c0_14 = arith.constant 0 : index
    %c8 = arith.constant 8 : index
    %24 = vector.load %arg1[%c0_13, %c0_14, %c8] : memref<1x8x96xf32, #tpu.memory_space<vmem>>, vector<1x8x8xf32>
    %25 = vector.shape_cast %24 : vector<1x8x8xf32> to vector<8x8xf32>
    %c0_15 = arith.constant 0 : index
    %c0_16 = arith.constant 0 : index
    %c40 = arith.constant 40 : index
    %26 = vector.load %arg1[%c0_15, %c0_16, %c40] : memref<1x8x96xf32, #tpu.memory_space<vmem>>, vector<1x8x8xf32>
    %27 = vector.shape_cast %26 : vector<1x8x8xf32> to vector<8x8xf32>
    %c0_17 = arith.constant 0 : index
    %c0_18 = arith.constant 0 : index
    %c72 = arith.constant 72 : index
    %28 = vector.load %arg1[%c0_17, %c0_18, %c72] : memref<1x8x96xf32, #tpu.memory_space<vmem>>, vector<1x8x8xf32>
    %29 = vector.shape_cast %28 : vector<1x8x8xf32> to vector<8x8xf32>
    %cst_19 = arith.constant dense<0.000000e+00> : vector<8x8xf32>
    %30 = tpu.matmul %25, %27, %cst_19 {dimension_numbers = #tpu.dot_dimension_numbers<[1], [1], [0], [0], [0, 0, 1, 0], [], []>} : vector<8x8xf32>, vector<8x8xf32>, vector<8x8xf32> -> vector<8x8xf32>
    %cst_20 = arith.constant 0.353553385 : f32
    %31 = vector.broadcast %cst_20 : f32 to vector<8x8xf32>
    %32 = arith.mulf %30, %31 : vector<8x8xf32>
    %33 = vector.broadcast %1 : vector<1x8xf32> to vector<8x8xf32>
    %34 = arith.addf %32, %33 : vector<8x8xf32>
    %cst_21 = arith.constant dense<0xFF800000> : vector<8xf32>
    %35 = vector.multi_reduction <maximumf>, %34, %cst_21 [1] : vector<8x8xf32> to vector<8xf32>
    %36 = vector.shape_cast %35 : vector<8xf32> to vector<8x1xf32>
    %37 = vector.broadcast %36 : vector<8x1xf32> to vector<8x8xf32>
    %38 = arith.subf %34, %37 : vector<8x8xf32>
    %39 = math.exp %38 : vector<8x8xf32>
    %cst_22 = arith.constant dense<0.000000e+00> : vector<8xf32>
    %40 = vector.multi_reduction <add>, %39, %cst_22 [1] : vector<8x8xf32> to vector<8xf32>
    %41 = vector.shape_cast %40 : vector<8xf32> to vector<8x1xf32>
    %42 = tpu.reciprocal %41 {approx = true} : vector<8x1xf32> -> vector<8x1xf32>
    %43 = vector.broadcast %42 : vector<8x1xf32> to vector<8x8xf32>
    %44 = arith.mulf %39, %43 : vector<8x8xf32>
    %cst_23 = arith.constant dense<0.000000e+00> : vector<8x8xf32>
    %45 = tpu.matmul %44, %29, %cst_23 {dimension_numbers = #tpu.dot_dimension_numbers<[1], [0], [0], [1], [0, 0, 1, 1], [], []>} : vector<8x8xf32>, vector<8x8xf32>, vector<8x8xf32> -> vector<8x8xf32>
    %c0_24 = arith.constant 0 : index
    %c0_25 = arith.constant 0 : index
    %c16 = arith.constant 16 : index
    %46 = vector.load %arg1[%c0_24, %c0_25, %c16] : memref<1x8x96xf32, #tpu.memory_space<vmem>>, vector<1x8x8xf32>
    %47 = vector.shape_cast %46 : vector<1x8x8xf32> to vector<8x8xf32>
    %c0_26 = arith.constant 0 : index
    %c0_27 = arith.constant 0 : index
    %c48 = arith.constant 48 : index
    %48 = vector.load %arg1[%c0_26, %c0_27, %c48] : memref<1x8x96xf32, #tpu.memory_space<vmem>>, vector<1x8x8xf32>
    %49 = vector.shape_cast %48 : vector<1x8x8xf32> to vector<8x8xf32>
    %c0_28 = arith.constant 0 : index
    %c0_29 = arith.constant 0 : index
    %c80 = arith.constant 80 : index
    %50 = vector.load %arg1[%c0_28, %c0_29, %c80] : memref<1x8x96xf32, #tpu.memory_space<vmem>>, vector<1x8x8xf32>
    %51 = vector.shape_cast %50 : vector<1x8x8xf32> to vector<8x8xf32>
    %cst_30 = arith.constant dense<0.000000e+00> : vector<8x8xf32>
    %52 = tpu.matmul %47, %49, %cst_30 {dimension_numbers = #tpu.dot_dimension_numbers<[1], [1], [0], [0], [0, 0, 1, 0], [], []>} : vector<8x8xf32>, vector<8x8xf32>, vector<8x8xf32> -> vector<8x8xf32>
    %cst_31 = arith.constant 0.353553385 : f32
    %53 = vector.broadcast %cst_31 : f32 to vector<8x8xf32>
    %54 = arith.mulf %52, %53 : vector<8x8xf32>
    %55 = vector.broadcast %1 : vector<1x8xf32> to vector<8x8xf32>
    %56 = arith.addf %54, %55 : vector<8x8xf32>
    %cst_32 = arith.constant dense<0xFF800000> : vector<8xf32>
    %57 = vector.multi_reduction <maximumf>, %56, %cst_32 [1] : vector<8x8xf32> to vector<8xf32>
    %58 = vector.shape_cast %57 : vector<8xf32> to vector<8x1xf32>
    %59 = vector.broadcast %58 : vector<8x1xf32> to vector<8x8xf32>
    %60 = arith.subf %56, %59 : vector<8x8xf32>
    %61 = math.exp %60 : vector<8x8xf32>
    %cst_33 = arith.constant dense<0.000000e+00> : vector<8xf32>
    %62 = vector.multi_reduction <add>, %61, %cst_33 [1] : vector<8x8xf32> to vector<8xf32>
    %63 = vector.shape_cast %62 : vector<8xf32> to vector<8x1xf32>
    %64 = tpu.reciprocal %63 {approx = true} : vector<8x1xf32> -> vector<8x1xf32>
    %65 = vector.broadcast %64 : vector<8x1xf32> to vector<8x8xf32>
    %66 = arith.mulf %61, %65 : vector<8x8xf32>
    %cst_34 = arith.constant dense<0.000000e+00> : vector<8x8xf32>
    %67 = tpu.matmul %66, %51, %cst_34 {dimension_numbers = #tpu.dot_dimension_numbers<[1], [0], [0], [1], [0, 0, 1, 1], [], []>} : vector<8x8xf32>, vector<8x8xf32>, vector<8x8xf32> -> vector<8x8xf32>
    %c0_35 = arith.constant 0 : index
    %c0_36 = arith.constant 0 : index
    %c24 = arith.constant 24 : index
    %68 = vector.load %arg1[%c0_35, %c0_36, %c24] : memref<1x8x96xf32, #tpu.memory_space<vmem>>, vector<1x8x8xf32>
    %69 = vector.shape_cast %68 : vector<1x8x8xf32> to vector<8x8xf32>
    %c0_37 = arith.constant 0 : index
    %c0_38 = arith.constant 0 : index
    %c56 = arith.constant 56 : index
    %70 = vector.load %arg1[%c0_37, %c0_38, %c56] : memref<1x8x96xf32, #tpu.memory_space<vmem>>, vector<1x8x8xf32>
    %71 = vector.shape_cast %70 : vector<1x8x8xf32> to vector<8x8xf32>
    %c0_39 = arith.constant 0 : index
    %c0_40 = arith.constant 0 : index
    %c88 = arith.constant 88 : index
    %72 = vector.load %arg1[%c0_39, %c0_40, %c88] : memref<1x8x96xf32, #tpu.memory_space<vmem>>, vector<1x8x8xf32>
    %73 = vector.shape_cast %72 : vector<1x8x8xf32> to vector<8x8xf32>
    %cst_41 = arith.constant dense<0.000000e+00> : vector<8x8xf32>
    %74 = tpu.matmul %69, %71, %cst_41 {dimension_numbers = #tpu.dot_dimension_numbers<[1], [1], [0], [0], [0, 0, 1, 0], [], []>} : vector<8x8xf32>, vector<8x8xf32>, vector<8x8xf32> -> vector<8x8xf32>
    %cst_42 = arith.constant 0.353553385 : f32
    %75 = vector.broadcast %cst_42 : f32 to vector<8x8xf32>
    %76 = arith.mulf %74, %75 : vector<8x8xf32>
    %77 = vector.broadcast %1 : vector<1x8xf32> to vector<8x8xf32>
    %78 = arith.addf %76, %77 : vector<8x8xf32>
    %cst_43 = arith.constant dense<0xFF800000> : vector<8xf32>
    %79 = vector.multi_reduction <maximumf>, %78, %cst_43 [1] : vector<8x8xf32> to vector<8xf32>
    %80 = vector.shape_cast %79 : vector<8xf32> to vector<8x1xf32>
    %81 = vector.broadcast %80 : vector<8x1xf32> to vector<8x8xf32>
    %82 = arith.subf %78, %81 : vector<8x8xf32>
    %83 = math.exp %82 : vector<8x8xf32>
    %cst_44 = arith.constant dense<0.000000e+00> : vector<8xf32>
    %84 = vector.multi_reduction <add>, %83, %cst_44 [1] : vector<8x8xf32> to vector<8xf32>
    %85 = vector.shape_cast %84 : vector<8xf32> to vector<8x1xf32>
    %86 = tpu.reciprocal %85 {approx = true} : vector<8x1xf32> -> vector<8x1xf32>
    %87 = vector.broadcast %86 : vector<8x1xf32> to vector<8x8xf32>
    %88 = arith.mulf %83, %87 : vector<8x8xf32>
    %cst_45 = arith.constant dense<0.000000e+00> : vector<8x8xf32>
    %89 = tpu.matmul %88, %73, %cst_45 {dimension_numbers = #tpu.dot_dimension_numbers<[1], [0], [0], [1], [0, 0, 1, 1], [], []>} : vector<8x8xf32>, vector<8x8xf32>, vector<8x8xf32> -> vector<8x8xf32>
    %90 = tpu.concatenate %23, %45, %67, %89 in 1 : vector<8x8xf32>, vector<8x8xf32>, vector<8x8xf32>, vector<8x8xf32> -> vector<8x32xf32>
    %c0_46 = arith.constant 0 : index
    %c0_47 = arith.constant 0 : index
    %c0_48 = arith.constant 0 : index
    %91 = vector.load %arg3[%c0_46, %c0_47, %c0_48] : memref<1x8x32xf32, #tpu.memory_space<vmem>>, vector<1x8x32xf32>
    %92 = vector.shape_cast %91 : vector<1x8x32xf32> to vector<8x32xf32>
    %93 = vector.shape_cast %90 : vector<8x32xf32> to vector<1x8x32xf32>
    tpu.vector_store %arg3[%c0_46, %c0_47, %c0_48], %93 {strides = array<i32>} : memref<1x8x32xf32, #tpu.memory_space<vmem>>, vector<1x8x32xf32>,
    return
  }
  func.func @transform_0(%arg0: i32) -> (i32, i32, i32) {
    %c0_i32 = arith.constant 0 : i32
    %c0_i32_0 = arith.constant 0 : i32
    %c0_i32_1 = arith.constant 0 : i32
    return %arg0, %c0_i32, %c0_i32_0 : i32, i32, i32
  }
  func.func @transform_1(%arg0: i32) -> (i32, i32, i32) {
    %c0_i32 = arith.constant 0 : i32
    %c0_i32_0 = arith.constant 0 : i32
    %c0_i32_1 = arith.constant 0 : i32
    return %arg0, %c0_i32, %c0_i32_0 : i32, i32, i32
  }
  func.func @transform_2(%arg0: i32) -> (i32, i32, i32) {
    %c0_i32 = arith.constant 0 : i32
    %c0_i32_0 = arith.constant 0 : i32
    %c0_i32_1 = arith.constant 0 : i32
    return %arg0, %c0_i32, %c0_i32_0 : i32, i32, i32
  }
}

module attributes {stable_mosaic.version = 11 : i64} {
  func.func @_linear_add_ln_kernel(%arg0: i32, %arg1: i32, %arg2: memref<8x32xf32, #tpu.memory_space<vmem>>, %arg3: memref<32x32xf32, #tpu.memory_space<vmem>>, %arg4: memref<1x32xf32, #tpu.memory_space<vmem>>, %arg5: memref<8x32xf32, #tpu.memory_space<vmem>>, %arg6: memref<1x32xf32, #tpu.memory_space<vmem>>, %arg7: memref<1x32xf32, #tpu.memory_space<vmem>>, %arg8: memref<8x32xf32, #tpu.memory_space<vmem>>, %arg9: memref<8x32xf32, #tpu.memory_space<vmem>>) attributes {dimension_semantics = [#tpu.dimension_semantics<parallel>, #tpu.dimension_semantics<arbitrary>], iteration_bounds = array<i64: 2, 1>, scalar_prefetch = 0 : i64, scratch_operands = 1 : i64, tpu.core_type = #tpu.core_type<tc>, window_params = [{transform_indices = @transform_0, window_bounds = array<i64: 8, 32>}, {transform_indices = @transform_1, window_bounds = array<i64: 32, 32>}, {pipeline_mode = #tpu.pipeline_mode<synchronous>, transform_indices = @transform_2, window_bounds = array<i64: 1, 32>}, {transform_indices = @transform_3, window_bounds = array<i64: 8, 32>}, {pipeline_mode = #tpu.pipeline_mode<synchronous>, transform_indices = @transform_4, window_bounds = array<i64: 1, 32>}, {pipeline_mode = #tpu.pipeline_mode<synchronous>, transform_indices = @transform_5, window_bounds = array<i64: 1, 32>}, {transform_indices = @transform_6, window_bounds = array<i64: 8, 32>}]} {
    %c0_i32 = arith.constant 0 : i32
    %0 = arith.cmpi eq, %arg1, %c0_i32 : i32
    %1 = arith.extui %0 : i1 to i32
    %c0_i32_0 = arith.constant 0 : i32
    %2 = arith.cmpi ne, %1, %c0_i32_0 : i32
    scf.if %2 {
      %cst_10 = arith.constant 0.000000e+00 : f32
      %12 = vector.broadcast %cst_10 : f32 to vector<8x32xf32>
      %c0_11 = arith.constant 0 : index
      %c0_12 = arith.constant 0 : index
      %13 = vector.load %arg9[%c0_11, %c0_12] : memref<8x32xf32, #tpu.memory_space<vmem>>, vector<8x32xf32>
      tpu.vector_store %arg9[%c0_11, %c0_12], %12 {strides = array<i32>} : memref<8x32xf32, #tpu.memory_space<vmem>>, vector<8x32xf32>,
    } else {
    }
    %c0 = arith.constant 0 : index
    %c0_1 = arith.constant 0 : index
    %3 = vector.load %arg9[%c0, %c0_1] : memref<8x32xf32, #tpu.memory_space<vmem>>, vector<8x32xf32>
    %c0_2 = arith.constant 0 : index
    %c0_3 = arith.constant 0 : index
    %4 = vector.load %arg2[%c0_2, %c0_3] : memref<8x32xf32, #tpu.memory_space<vmem>>, vector<8x32xf32>
    %c0_4 = arith.constant 0 : index
    %c0_5 = arith.constant 0 : index
    %5 = vector.load %arg3[%c0_4, %c0_5] : memref<32x32xf32, #tpu.memory_space<vmem>>, vector<32x32xf32>
    %cst = arith.constant dense<0.000000e+00> : vector<8x32xf32>
    %6 = tpu.matmul %4, %5, %cst {dimension_numbers = #tpu.dot_dimension_numbers<[1], [0], [0], [1], [0, 0, 1, 1], [], []>} : vector<8x32xf32>, vector<32x32xf32>, vector<8x32xf32> -> vector<8x32xf32>
    %7 = arith.addf %3, %6 : vector<8x32xf32>
    %c0_6 = arith.constant 0 : index
    %c0_7 = arith.constant 0 : index
    %8 = vector.load %arg9[%c0_6, %c0_7] : memref<8x32xf32, #tpu.memory_space<vmem>>, vector<8x32xf32>
    tpu.vector_store %arg9[%c0_6, %c0_7], %7 {strides = array<i32>} : memref<8x32xf32, #tpu.memory_space<vmem>>, vector<8x32xf32>,
    %c0_i32_8 = arith.constant 0 : i32
    %9 = arith.cmpi eq, %arg1, %c0_i32_8 : i32
    %10 = arith.extui %9 : i1 to i32
    %c0_i32_9 = arith.constant 0 : i32
    %11 = arith.cmpi ne, %10, %c0_i32_9 : i32
    scf.if %11 {
      %c0_10 = arith.constant 0 : index
      %c0_11 = arith.constant 0 : index
      %12 = vector.load %arg9[%c0_10, %c0_11] : memref<8x32xf32, #tpu.memory_space<vmem>>, vector<8x32xf32>
      %c0_12 = arith.constant 0 : index
      %c0_13 = arith.constant 0 : index
      %13 = vector.load %arg4[%c0_12, %c0_13] : memref<1x32xf32, #tpu.memory_space<vmem>>, vector<1x32xf32>
      %14 = vector.broadcast %13 : vector<1x32xf32> to vector<8x32xf32>
      %15 = arith.addf %12, %14 : vector<8x32xf32>
      %c0_14 = arith.constant 0 : index
      %c0_15 = arith.constant 0 : index
      %16 = vector.load %arg5[%c0_14, %c0_15] : memref<8x32xf32, #tpu.memory_space<vmem>>, vector<8x32xf32>
      %17 = arith.addf %15, %16 : vector<8x32xf32>
      %cst_16 = arith.constant dense<0.000000e+00> : vector<8xf32>
      %18 = vector.multi_reduction <add>, %17, %cst_16 [1] : vector<8x32xf32> to vector<8xf32>
      %19 = vector.shape_cast %18 : vector<8xf32> to vector<8x1xf32>
      %cst_17 = arith.constant 3.200000e+01 : f32
      %20 = vector.broadcast %cst_17 : f32 to vector<8x1xf32>
      %21 = arith.divf %19, %20 : vector<8x1xf32>
      %22 = vector.broadcast %21 : vector<8x1xf32> to vector<8x32xf32>
      %23 = arith.subf %17, %22 : vector<8x32xf32>
      %24 = arith.mulf %23, %23 : vector<8x32xf32>
      %cst_18 = arith.constant dense<0.000000e+00> : vector<8xf32>
      %25 = vector.multi_reduction <add>, %24, %cst_18 [1] : vector<8x32xf32> to vector<8xf32>
      %26 = vector.shape_cast %25 : vector<8xf32> to vector<8x1xf32>
      %cst_19 = arith.constant 3.200000e+01 : f32
      %27 = vector.broadcast %cst_19 : f32 to vector<8x1xf32>
      %28 = arith.divf %26, %27 : vector<8x1xf32>
      %cst_20 = arith.constant 9.99999996E-13 : f32
      %29 = vector.broadcast %cst_20 : f32 to vector<8x1xf32>
      %30 = arith.addf %28, %29 : vector<8x1xf32>
      %31 = math.rsqrt %30 : vector<8x1xf32>
      %32 = vector.broadcast %31 : vector<8x1xf32> to vector<8x32xf32>
      %33 = arith.mulf %23, %32 : vector<8x32xf32>
      %c0_21 = arith.constant 0 : index
      %c0_22 = arith.constant 0 : index
      %34 = vector.load %arg6[%c0_21, %c0_22] : memref<1x32xf32, #tpu.memory_space<vmem>>, vector<1x32xf32>
      %35 = vector.broadcast %34 : vector<1x32xf32> to vector<8x32xf32>
      %36 = arith.mulf %33, %35 : vector<8x32xf32>
      %c0_23 = arith.constant 0 : index
      %c0_24 = arith.constant 0 : index
      %37 = vector.load %arg7[%c0_23, %c0_24] : memref<1x32xf32, #tpu.memory_space<vmem>>, vector<1x32xf32>
      %38 = vector.broadcast %37 : vector<1x32xf32> to vector<8x32xf32>
      %39 = arith.addf %36, %38 : vector<8x32xf32>
      %c0_25 = arith.constant 0 : index
      %c0_26 = arith.constant 0 : index
      %40 = vector.load %arg8[%c0_25, %c0_26] : memref<8x32xf32, #tpu.memory_space<vmem>>, vector<8x32xf32>
      tpu.vector_store %arg8[%c0_25, %c0_26], %39 {strides = array<i32>} : memref<8x32xf32, #tpu.memory_space<vmem>>, vector<8x32xf32>,
    } else {
    }
    return
  }
  func.func @transform_0(%arg0: i32, %arg1: i32) -> (i32, i32) {
    %c0_i32 = arith.constant 0 : i32
    return %arg0, %arg1 : i32, i32
  }
  func.func @transform_1(%arg0: i32, %arg1: i32) -> (i32, i32) {
    %c0_i32 = arith.constant 0 : i32
    %c0_i32_0 = arith.constant 0 : i32
    return %arg1, %c0_i32 : i32, i32
  }
  func.func @transform_2(%arg0: i32, %arg1: i32) -> (i32, i32) {
    %c0_i32 = arith.constant 0 : i32
    %c0_i32_0 = arith.constant 0 : i32
    %c0_i32_1 = arith.constant 0 : i32
    return %c0_i32, %c0_i32_0 : i32, i32
  }
  func.func @transform_3(%arg0: i32, %arg1: i32) -> (i32, i32) {
    %c0_i32 = arith.constant 0 : i32
    %c0_i32_0 = arith.constant 0 : i32
    return %arg0, %c0_i32 : i32, i32
  }
  func.func @transform_4(%arg0: i32, %arg1: i32) -> (i32, i32) {
    %c0_i32 = arith.constant 0 : i32
    %c0_i32_0 = arith.constant 0 : i32
    %c0_i32_1 = arith.constant 0 : i32
    return %c0_i32, %c0_i32_0 : i32, i32
  }
  func.func @transform_5(%arg0: i32, %arg1: i32) -> (i32, i32) {
    %c0_i32 = arith.constant 0 : i32
    %c0_i32_0 = arith.constant 0 : i32
    %c0_i32_1 = arith.constant 0 : i32
    return %c0_i32, %c0_i32_0 : i32, i32
  }
  func.func @transform_6(%arg0: i32, %arg1: i32) -> (i32, i32) {
    %c0_i32 = arith.constant 0 : i32
    %c0_i32_0 = arith.constant 0 : i32
    return %arg0, %c0_i32 : i32, i32
  }
}

module attributes {stable_mosaic.version = 11 : i64} {
  func.func @_linear_kernel(%arg0: i32, %arg1: i32, %arg2: i32, %arg3: memref<8x32xf32, #tpu.memory_space<vmem>>, %arg4: memref<32x64xf32, #tpu.memory_space<vmem>>, %arg5: memref<1x64xf32, #tpu.memory_space<vmem>>, %arg6: memref<8x64xf32, #tpu.memory_space<vmem>>, %arg7: memref<8x64xf32, #tpu.memory_space<vmem>>) attributes {dimension_semantics = [#tpu.dimension_semantics<parallel>, #tpu.dimension_semantics<parallel>, #tpu.dimension_semantics<arbitrary>], iteration_bounds = array<i64: 2, 1, 1>, scalar_prefetch = 0 : i64, scratch_operands = 1 : i64, tpu.core_type = #tpu.core_type<tc>, window_params = [{transform_indices = @transform_0, window_bounds = array<i64: 8, 32>}, {transform_indices = @transform_1, window_bounds = array<i64: 32, 64>}, {transform_indices = @transform_2, window_bounds = array<i64: 1, 64>}, {transform_indices = @transform_3, window_bounds = array<i64: 8, 64>}]} {
    %c0_i32 = arith.constant 0 : i32
    %0 = arith.cmpi eq, %arg2, %c0_i32 : i32
    %1 = arith.extui %0 : i1 to i32
    %c0_i32_0 = arith.constant 0 : i32
    %2 = arith.cmpi ne, %1, %c0_i32_0 : i32
    scf.if %2 {
      %cst_10 = arith.constant 0.000000e+00 : f32
      %12 = vector.broadcast %cst_10 : f32 to vector<8x64xf32>
      %c0_11 = arith.constant 0 : index
      %c0_12 = arith.constant 0 : index
      %13 = vector.load %arg7[%c0_11, %c0_12] : memref<8x64xf32, #tpu.memory_space<vmem>>, vector<8x64xf32>
      tpu.vector_store %arg7[%c0_11, %c0_12], %12 {strides = array<i32>} : memref<8x64xf32, #tpu.memory_space<vmem>>, vector<8x64xf32>,
    } else {
    }
    %c0 = arith.constant 0 : index
    %c0_1 = arith.constant 0 : index
    %3 = vector.load %arg7[%c0, %c0_1] : memref<8x64xf32, #tpu.memory_space<vmem>>, vector<8x64xf32>
    %c0_2 = arith.constant 0 : index
    %c0_3 = arith.constant 0 : index
    %4 = vector.load %arg3[%c0_2, %c0_3] : memref<8x32xf32, #tpu.memory_space<vmem>>, vector<8x32xf32>
    %c0_4 = arith.constant 0 : index
    %c0_5 = arith.constant 0 : index
    %5 = vector.load %arg4[%c0_4, %c0_5] : memref<32x64xf32, #tpu.memory_space<vmem>>, vector<32x64xf32>
    %cst = arith.constant dense<0.000000e+00> : vector<8x64xf32>
    %6 = tpu.matmul %4, %5, %cst {dimension_numbers = #tpu.dot_dimension_numbers<[1], [0], [0], [1], [0, 0, 1, 1], [], []>} : vector<8x32xf32>, vector<32x64xf32>, vector<8x64xf32> -> vector<8x64xf32>
    %7 = arith.addf %3, %6 : vector<8x64xf32>
    %c0_6 = arith.constant 0 : index
    %c0_7 = arith.constant 0 : index
    %8 = vector.load %arg7[%c0_6, %c0_7] : memref<8x64xf32, #tpu.memory_space<vmem>>, vector<8x64xf32>
    tpu.vector_store %arg7[%c0_6, %c0_7], %7 {strides = array<i32>} : memref<8x64xf32, #tpu.memory_space<vmem>>, vector<8x64xf32>,
    %c0_i32_8 = arith.constant 0 : i32
    %9 = arith.cmpi eq, %arg2, %c0_i32_8 : i32
    %10 = arith.extui %9 : i1 to i32
    %c0_i32_9 = arith.constant 0 : i32
    %11 = arith.cmpi ne, %10, %c0_i32_9 : i32
    scf.if %11 {
      %c0_10 = arith.constant 0 : index
      %c0_11 = arith.constant 0 : index
      %12 = vector.load %arg7[%c0_10, %c0_11] : memref<8x64xf32, #tpu.memory_space<vmem>>, vector<8x64xf32>
      %c0_12 = arith.constant 0 : index
      %c0_13 = arith.constant 0 : index
      %13 = vector.load %arg5[%c0_12, %c0_13] : memref<1x64xf32, #tpu.memory_space<vmem>>, vector<1x64xf32>
      %14 = vector.broadcast %13 : vector<1x64xf32> to vector<8x64xf32>
      %15 = arith.addf %12, %14 : vector<8x64xf32>
      %cst_14 = arith.constant 5.000000e-01 : f32
      %16 = vector.broadcast %cst_14 : f32 to vector<8x64xf32>
      %17 = arith.mulf %16, %15 : vector<8x64xf32>
      %cst_15 = arith.constant 4.471500e-02 : f32
      %18 = vector.broadcast %cst_15 : f32 to vector<8x64xf32>
      %19 = arith.mulf %18, %15 : vector<8x64xf32>
      %20 = arith.mulf %19, %15 : vector<8x64xf32>
      %21 = arith.mulf %20, %15 : vector<8x64xf32>
      %22 = arith.addf %15, %21 : vector<8x64xf32>
      %cst_16 = arith.constant 0.797884583 : f32
      %23 = vector.broadcast %cst_16 : f32 to vector<8x64xf32>
      %24 = arith.mulf %23, %22 : vector<8x64xf32>
      %25 = math.tanh %24 : vector<8x64xf32>
      %cst_17 = arith.constant 1.000000e+00 : f32
      %26 = vector.broadcast %cst_17 : f32 to vector<8x64xf32>
      %27 = arith.addf %26, %25 : vector<8x64xf32>
      %28 = arith.mulf %17, %27 : vector<8x64xf32>
      %c0_18 = arith.constant 0 : index
      %c0_19 = arith.constant 0 : index
      %29 = vector.load %arg6[%c0_18, %c0_19] : memref<8x64xf32, #tpu.memory_space<vmem>>, vector<8x64xf32>
      tpu.vector_store %arg6[%c0_18, %c0_19], %28 {strides = array<i32>} : memref<8x64xf32, #tpu.memory_space<vmem>>, vector<8x64xf32>,
    } else {
    }
    return
  }
  func.func @transform_0(%arg0: i32, %arg1: i32, %arg2: i32) -> (i32, i32) {
    %c0_i32 = arith.constant 0 : i32
    return %arg0, %arg2 : i32, i32
  }
  func.func @transform_1(%arg0: i32, %arg1: i32, %arg2: i32) -> (i32, i32) {
    %c0_i32 = arith.constant 0 : i32
    return %arg2, %arg1 : i32, i32
  }
  func.func @transform_2(%arg0: i32, %arg1: i32, %arg2: i32) -> (i32, i32) {
    %c0_i32 = arith.constant 0 : i32
    %c0_i32_0 = arith.constant 0 : i32
    return %c0_i32, %arg1 : i32, i32
  }
  func.func @transform_3(%arg0: i32, %arg1: i32, %arg2: i32) -> (i32, i32) {
    %c0_i32 = arith.constant 0 : i32
    return %arg0, %arg1 : i32, i32
  }
}

module attributes {stable_mosaic.version = 11 : i64} {
  func.func @_linear_add_ln_kernel(%arg0: i32, %arg1: i32, %arg2: memref<8x64xf32, #tpu.memory_space<vmem>>, %arg3: memref<64x32xf32, #tpu.memory_space<vmem>>, %arg4: memref<1x32xf32, #tpu.memory_space<vmem>>, %arg5: memref<8x32xf32, #tpu.memory_space<vmem>>, %arg6: memref<1x32xf32, #tpu.memory_space<vmem>>, %arg7: memref<1x32xf32, #tpu.memory_space<vmem>>, %arg8: memref<8x32xf32, #tpu.memory_space<vmem>>, %arg9: memref<8x32xf32, #tpu.memory_space<vmem>>) attributes {dimension_semantics = [#tpu.dimension_semantics<parallel>, #tpu.dimension_semantics<arbitrary>], iteration_bounds = array<i64: 2, 1>, scalar_prefetch = 0 : i64, scratch_operands = 1 : i64, tpu.core_type = #tpu.core_type<tc>, window_params = [{transform_indices = @transform_0, window_bounds = array<i64: 8, 64>}, {transform_indices = @transform_1, window_bounds = array<i64: 64, 32>}, {pipeline_mode = #tpu.pipeline_mode<synchronous>, transform_indices = @transform_2, window_bounds = array<i64: 1, 32>}, {transform_indices = @transform_3, window_bounds = array<i64: 8, 32>}, {pipeline_mode = #tpu.pipeline_mode<synchronous>, transform_indices = @transform_4, window_bounds = array<i64: 1, 32>}, {pipeline_mode = #tpu.pipeline_mode<synchronous>, transform_indices = @transform_5, window_bounds = array<i64: 1, 32>}, {transform_indices = @transform_6, window_bounds = array<i64: 8, 32>}]} {
    %c0_i32 = arith.constant 0 : i32
    %0 = arith.cmpi eq, %arg1, %c0_i32 : i32
    %1 = arith.extui %0 : i1 to i32
    %c0_i32_0 = arith.constant 0 : i32
    %2 = arith.cmpi ne, %1, %c0_i32_0 : i32
    scf.if %2 {
      %cst_10 = arith.constant 0.000000e+00 : f32
      %12 = vector.broadcast %cst_10 : f32 to vector<8x32xf32>
      %c0_11 = arith.constant 0 : index
      %c0_12 = arith.constant 0 : index
      %13 = vector.load %arg9[%c0_11, %c0_12] : memref<8x32xf32, #tpu.memory_space<vmem>>, vector<8x32xf32>
      tpu.vector_store %arg9[%c0_11, %c0_12], %12 {strides = array<i32>} : memref<8x32xf32, #tpu.memory_space<vmem>>, vector<8x32xf32>,
    } else {
    }
    %c0 = arith.constant 0 : index
    %c0_1 = arith.constant 0 : index
    %3 = vector.load %arg9[%c0, %c0_1] : memref<8x32xf32, #tpu.memory_space<vmem>>, vector<8x32xf32>
    %c0_2 = arith.constant 0 : index
    %c0_3 = arith.constant 0 : index
    %4 = vector.load %arg2[%c0_2, %c0_3] : memref<8x64xf32, #tpu.memory_space<vmem>>, vector<8x64xf32>
    %c0_4 = arith.constant 0 : index
    %c0_5 = arith.constant 0 : index
    %5 = vector.load %arg3[%c0_4, %c0_5] : memref<64x32xf32, #tpu.memory_space<vmem>>, vector<64x32xf32>
    %cst = arith.constant dense<0.000000e+00> : vector<8x32xf32>
    %6 = tpu.matmul %4, %5, %cst {dimension_numbers = #tpu.dot_dimension_numbers<[1], [0], [0], [1], [0, 0, 1, 1], [], []>} : vector<8x64xf32>, vector<64x32xf32>, vector<8x32xf32> -> vector<8x32xf32>
    %7 = arith.addf %3, %6 : vector<8x32xf32>
    %c0_6 = arith.constant 0 : index
    %c0_7 = arith.constant 0 : index
    %8 = vector.load %arg9[%c0_6, %c0_7] : memref<8x32xf32, #tpu.memory_space<vmem>>, vector<8x32xf32>
    tpu.vector_store %arg9[%c0_6, %c0_7], %7 {strides = array<i32>} : memref<8x32xf32, #tpu.memory_space<vmem>>, vector<8x32xf32>,
    %c0_i32_8 = arith.constant 0 : i32
    %9 = arith.cmpi eq, %arg1, %c0_i32_8 : i32
    %10 = arith.extui %9 : i1 to i32
    %c0_i32_9 = arith.constant 0 : i32
    %11 = arith.cmpi ne, %10, %c0_i32_9 : i32
    scf.if %11 {
      %c0_10 = arith.constant 0 : index
      %c0_11 = arith.constant 0 : index
      %12 = vector.load %arg9[%c0_10, %c0_11] : memref<8x32xf32, #tpu.memory_space<vmem>>, vector<8x32xf32>
      %c0_12 = arith.constant 0 : index
      %c0_13 = arith.constant 0 : index
      %13 = vector.load %arg4[%c0_12, %c0_13] : memref<1x32xf32, #tpu.memory_space<vmem>>, vector<1x32xf32>
      %14 = vector.broadcast %13 : vector<1x32xf32> to vector<8x32xf32>
      %15 = arith.addf %12, %14 : vector<8x32xf32>
      %c0_14 = arith.constant 0 : index
      %c0_15 = arith.constant 0 : index
      %16 = vector.load %arg5[%c0_14, %c0_15] : memref<8x32xf32, #tpu.memory_space<vmem>>, vector<8x32xf32>
      %17 = arith.addf %15, %16 : vector<8x32xf32>
      %cst_16 = arith.constant dense<0.000000e+00> : vector<8xf32>
      %18 = vector.multi_reduction <add>, %17, %cst_16 [1] : vector<8x32xf32> to vector<8xf32>
      %19 = vector.shape_cast %18 : vector<8xf32> to vector<8x1xf32>
      %cst_17 = arith.constant 3.200000e+01 : f32
      %20 = vector.broadcast %cst_17 : f32 to vector<8x1xf32>
      %21 = arith.divf %19, %20 : vector<8x1xf32>
      %22 = vector.broadcast %21 : vector<8x1xf32> to vector<8x32xf32>
      %23 = arith.subf %17, %22 : vector<8x32xf32>
      %24 = arith.mulf %23, %23 : vector<8x32xf32>
      %cst_18 = arith.constant dense<0.000000e+00> : vector<8xf32>
      %25 = vector.multi_reduction <add>, %24, %cst_18 [1] : vector<8x32xf32> to vector<8xf32>
      %26 = vector.shape_cast %25 : vector<8xf32> to vector<8x1xf32>
      %cst_19 = arith.constant 3.200000e+01 : f32
      %27 = vector.broadcast %cst_19 : f32 to vector<8x1xf32>
      %28 = arith.divf %26, %27 : vector<8x1xf32>
      %cst_20 = arith.constant 9.99999996E-13 : f32
      %29 = vector.broadcast %cst_20 : f32 to vector<8x1xf32>
      %30 = arith.addf %28, %29 : vector<8x1xf32>
      %31 = math.rsqrt %30 : vector<8x1xf32>
      %32 = vector.broadcast %31 : vector<8x1xf32> to vector<8x32xf32>
      %33 = arith.mulf %23, %32 : vector<8x32xf32>
      %c0_21 = arith.constant 0 : index
      %c0_22 = arith.constant 0 : index
      %34 = vector.load %arg6[%c0_21, %c0_22] : memref<1x32xf32, #tpu.memory_space<vmem>>, vector<1x32xf32>
      %35 = vector.broadcast %34 : vector<1x32xf32> to vector<8x32xf32>
      %36 = arith.mulf %33, %35 : vector<8x32xf32>
      %c0_23 = arith.constant 0 : index
      %c0_24 = arith.constant 0 : index
      %37 = vector.load %arg7[%c0_23, %c0_24] : memref<1x32xf32, #tpu.memory_space<vmem>>, vector<1x32xf32>
      %38 = vector.broadcast %37 : vector<1x32xf32> to vector<8x32xf32>
      %39 = arith.addf %36, %38 : vector<8x32xf32>
      %c0_25 = arith.constant 0 : index
      %c0_26 = arith.constant 0 : index
      %40 = vector.load %arg8[%c0_25, %c0_26] : memref<8x32xf32, #tpu.memory_space<vmem>>, vector<8x32xf32>
      tpu.vector_store %arg8[%c0_25, %c0_26], %39 {strides = array<i32>} : memref<8x32xf32, #tpu.memory_space<vmem>>, vector<8x32xf32>,
    } else {
    }
    return
  }
  func.func @transform_0(%arg0: i32, %arg1: i32) -> (i32, i32) {
    %c0_i32 = arith.constant 0 : i32
    return %arg0, %arg1 : i32, i32
  }
  func.func @transform_1(%arg0: i32, %arg1: i32) -> (i32, i32) {
    %c0_i32 = arith.constant 0 : i32
    %c0_i32_0 = arith.constant 0 : i32
    return %arg1, %c0_i32 : i32, i32
  }
  func.func @transform_2(%arg0: i32, %arg1: i32) -> (i32, i32) {
    %c0_i32 = arith.constant 0 : i32
    %c0_i32_0 = arith.constant 0 : i32
    %c0_i32_1 = arith.constant 0 : i32
    return %c0_i32, %c0_i32_0 : i32, i32
  }
  func.func @transform_3(%arg0: i32, %arg1: i32) -> (i32, i32) {
    %c0_i32 = arith.constant 0 : i32
    %c0_i32_0 = arith.constant 0 : i32
    return %arg0, %c0_i32 : i32, i32
  }
  func.func @transform_4(%arg0: i32, %arg1: i32) -> (i32, i32) {
    %c0_i32 = arith.constant 0 : i32
    %c0_i32_0 = arith.constant 0 : i32
    %c0_i32_1 = arith.constant 0 : i32
    return %c0_i32, %c0_i32_0 : i32, i32
  }
  func.func @transform_5(%arg0: i32, %arg1: i32) -> (i32, i32) {
    %c0_i32 = arith.constant 0 : i32
    %c0_i32_0 = arith.constant 0 : i32
    %c0_i32_1 = arith.constant 0 : i32
    return %c0_i32, %c0_i32_0 : i32, i32
  }
  func.func @transform_6(%arg0: i32, %arg1: i32) -> (i32, i32) {
    %c0_i32 = arith.constant 0 : i32
    %c0_i32_0 = arith.constant 0 : i32
    return %arg0, %c0_i32 : i32, i32
  }
}

module attributes {stable_mosaic.version = 11 : i64} {
  func.func @_pool_combine_kernel(%arg0: i32, %arg1: memref<1x8x32xf32, #tpu.memory_space<vmem>>, %arg2: memref<1x8x1xf32, #tpu.memory_space<vmem>>, %arg3: memref<32x1xf32, #tpu.memory_space<vmem>>, %arg4: memref<1x1xf32, #tpu.memory_space<vmem>>, %arg5: memref<32x32xf32, #tpu.memory_space<vmem>>, %arg6: memref<1x32xf32, #tpu.memory_space<vmem>>, %arg7: memref<128x32xf32, #tpu.memory_space<vmem>>, %arg8: memref<1x32xf32, #tpu.memory_space<vmem>>, %arg9: memref<1x1x32xf32, #tpu.memory_space<vmem>>) attributes {dimension_semantics = [#tpu.dimension_semantics<parallel>], iteration_bounds = array<i64: 2>, scalar_prefetch = 0 : i64, scratch_operands = 0 : i64, tpu.core_type = #tpu.core_type<tc>, window_params = [{transform_indices = @transform_0, window_bounds = array<i64: 1, 8, 32>}, {transform_indices = @transform_1, window_bounds = array<i64: 1, 8, 1>}, {pipeline_mode = #tpu.pipeline_mode<synchronous>, transform_indices = @transform_2, window_bounds = array<i64: 32, 1>}, {pipeline_mode = #tpu.pipeline_mode<synchronous>, transform_indices = @transform_3, window_bounds = array<i64: 1, 1>}, {pipeline_mode = #tpu.pipeline_mode<synchronous>, transform_indices = @transform_4, window_bounds = array<i64: 32, 32>}, {pipeline_mode = #tpu.pipeline_mode<synchronous>, transform_indices = @transform_5, window_bounds = array<i64: 1, 32>}, {pipeline_mode = #tpu.pipeline_mode<synchronous>, transform_indices = @transform_6, window_bounds = array<i64: 128, 32>}, {pipeline_mode = #tpu.pipeline_mode<synchronous>, transform_indices = @transform_7, window_bounds = array<i64: 1, 32>}, {transform_indices = @transform_8, window_bounds = array<i64: 1, 1, 32>}]} {
    %c0 = arith.constant 0 : index
    %c0_0 = arith.constant 0 : index
    %c0_1 = arith.constant 0 : index
    %0 = vector.load %arg1[%c0, %c0_0, %c0_1] : memref<1x8x32xf32, #tpu.memory_space<vmem>>, vector<1x8x32xf32>
    %1 = vector.shape_cast %0 : vector<1x8x32xf32> to vector<8x32xf32>
    %c0_2 = arith.constant 0 : index
    %c0_3 = arith.constant 0 : index
    %c0_4 = arith.constant 0 : index
    %2 = vector.load %arg2[%c0_2, %c0_3, %c0_4] : memref<1x8x1xf32, #tpu.memory_space<vmem>>, vector<1x8x1xf32>
    %3 = vector.shape_cast %2 : vector<1x8x1xf32> to vector<8x1xf32>
    %c0_5 = arith.constant 0 : index
    %c0_6 = arith.constant 0 : index
    %4 = vector.load %arg3[%c0_5, %c0_6] : memref<32x1xf32, #tpu.memory_space<vmem>>, vector<32x1xf32>
    %cst = arith.constant dense<0.000000e+00> : vector<8x1xf32>
    %5 = tpu.matmul %1, %4, %cst {dimension_numbers = #tpu.dot_dimension_numbers<[1], [0], [0], [1], [0, 0, 1, 1], [], []>} : vector<8x32xf32>, vector<32x1xf32>, vector<8x1xf32> -> vector<8x1xf32>
    %c0_7 = arith.constant 0 : index
    %c0_8 = arith.constant 0 : index
    %6 = vector.load %arg4[%c0_7, %c0_8] : memref<1x1xf32, #tpu.memory_space<vmem>>, vector<1x1xf32>
    %7 = vector.broadcast %6 : vector<1x1xf32> to vector<8x1xf32>
    %8 = arith.addf %5, %7 : vector<8x1xf32>
    %9 = vector.shape_cast %8 : vector<8x1xf32> to vector<1x8x1xf32>
    %cst_9 = arith.constant dense<0xFF800000> : vector<1xf32>
    %10 = vector.multi_reduction <maximumf>, %9, %cst_9 [1, 2] : vector<1x8x1xf32> to vector<1xf32>
    %11 = vector.shape_cast %10 : vector<1xf32> to vector<1x1x1xf32>
    %12 = vector.extract %11[0, 0, 0] : f32 from vector<1x1x1xf32>
    %13 = vector.broadcast %12 : f32 to vector<1x1xf32>
    %14 = vector.broadcast %13 : vector<1x1xf32> to vector<8x1xf32>
    %15 = arith.subf %8, %14 : vector<8x1xf32>
    %16 = math.exp %15 : vector<8x1xf32>
    %17 = arith.mulf %16, %3 : vector<8x1xf32>
    %18 = vector.shape_cast %17 : vector<8x1xf32> to vector<1x8x1xf32>
    %cst_10 = arith.constant dense<0.000000e+00> : vector<1xf32>
    %19 = vector.multi_reduction <add>, %18, %cst_10 [1, 2] : vector<1x8x1xf32> to vector<1xf32>
    %20 = vector.shape_cast %19 : vector<1xf32> to vector<1x1x1xf32>
    %21 = vector.extract %20[0, 0, 0] : f32 from vector<1x1x1xf32>
    %22 = vector.broadcast %21 : f32 to vector<1x1xf32>
    %23 = tpu.reciprocal %22 {approx = true} : vector<1x1xf32> -> vector<1x1xf32>
    %24 = vector.broadcast %23 : vector<1x1xf32> to vector<8x1xf32>
    %25 = arith.mulf %17, %24 : vector<8x1xf32>
    %cst_11 = arith.constant dense<0.000000e+00> : vector<1x32xf32>
    %26 = tpu.matmul %25, %1, %cst_11 {dimension_numbers = #tpu.dot_dimension_numbers<[0], [0], [1], [1], [0, 1, 1, 1], [], []>} : vector<8x1xf32>, vector<8x32xf32>, vector<1x32xf32> -> vector<1x32xf32>
    %27 = vector.extract_strided_slice %1 {offsets = [0, 0], sizes = [1, 32], strides = [1, 1]} : vector<8x32xf32> to vector<1x32xf32>
    %c0_12 = arith.constant 0 : index
    %c0_13 = arith.constant 0 : index
    %28 = vector.load %arg5[%c0_12, %c0_13] : memref<32x32xf32, #tpu.memory_space<vmem>>, vector<32x32xf32>
    %cst_14 = arith.constant dense<0.000000e+00> : vector<1x32xf32>
    %29 = tpu.matmul %27, %28, %cst_14 {dimension_numbers = #tpu.dot_dimension_numbers<[1], [0], [0], [1], [0, 0, 1, 1], [], []>} : vector<1x32xf32>, vector<32x32xf32>, vector<1x32xf32> -> vector<1x32xf32>
    %c0_15 = arith.constant 0 : index
    %c0_16 = arith.constant 0 : index
    %30 = vector.load %arg6[%c0_15, %c0_16] : memref<1x32xf32, #tpu.memory_space<vmem>>, vector<1x32xf32>
    %31 = arith.addf %29, %30 : vector<1x32xf32>
    %32 = math.tanh %31 : vector<1x32xf32>
    %cst_17 = arith.constant dense<0.000000e+00> : vector<32xf32>
    %33 = vector.multi_reduction <add>, %1, %cst_17 [0] : vector<8x32xf32> to vector<32xf32>
    %34 = vector.shape_cast %33 : vector<32xf32> to vector<1x32xf32>
    %cst_18 = arith.constant 8.000000e+00 : f32
    %35 = vector.broadcast %cst_18 : f32 to vector<1x32xf32>
    %36 = arith.divf %34, %35 : vector<1x32xf32>
    %cst_19 = arith.constant dense<0xFF800000> : vector<32xf32>
    %37 = vector.multi_reduction <maximumf>, %1, %cst_19 [0] : vector<8x32xf32> to vector<32xf32>
    %38 = vector.shape_cast %37 : vector<32xf32> to vector<1x32xf32>
    %c0_20 = arith.constant 0 : index
    %c0_21 = arith.constant 0 : index
    %39 = vector.load %arg7[%c0_20, %c0_21] : memref<128x32xf32, #tpu.memory_space<vmem>>, vector<32x32xf32>
    %cst_22 = arith.constant dense<0.000000e+00> : vector<1x32xf32>
    %40 = tpu.matmul %26, %39, %cst_22 {dimension_numbers = #tpu.dot_dimension_numbers<[1], [0], [0], [1], [0, 0, 1, 1], [], []>} : vector<1x32xf32>, vector<32x32xf32>, vector<1x32xf32> -> vector<1x32xf32>
    %c32 = arith.constant 32 : index
    %c0_23 = arith.constant 0 : index
    %41 = vector.load %arg7[%c32, %c0_23] : memref<128x32xf32, #tpu.memory_space<vmem>>, vector<32x32xf32>
    %cst_24 = arith.constant dense<0.000000e+00> : vector<1x32xf32>
    %42 = tpu.matmul %32, %41, %cst_24 {dimension_numbers = #tpu.dot_dimension_numbers<[1], [0], [0], [1], [0, 0, 1, 1], [], []>} : vector<1x32xf32>, vector<32x32xf32>, vector<1x32xf32> -> vector<1x32xf32>
    %43 = arith.addf %40, %42 : vector<1x32xf32>
    %c64 = arith.constant 64 : index
    %c0_25 = arith.constant 0 : index
    %44 = vector.load %arg7[%c64, %c0_25] : memref<128x32xf32, #tpu.memory_space<vmem>>, vector<32x32xf32>
    %cst_26 = arith.constant dense<0.000000e+00> : vector<1x32xf32>
    %45 = tpu.matmul %36, %44, %cst_26 {dimension_numbers = #tpu.dot_dimension_numbers<[1], [0], [0], [1], [0, 0, 1, 1], [], []>} : vector<1x32xf32>, vector<32x32xf32>, vector<1x32xf32> -> vector<1x32xf32>
    %46 = arith.addf %43, %45 : vector<1x32xf32>
    %c96 = arith.constant 96 : index
    %c0_27 = arith.constant 0 : index
    %47 = vector.load %arg7[%c96, %c0_27] : memref<128x32xf32, #tpu.memory_space<vmem>>, vector<32x32xf32>
    %cst_28 = arith.constant dense<0.000000e+00> : vector<1x32xf32>
    %48 = tpu.matmul %38, %47, %cst_28 {dimension_numbers = #tpu.dot_dimension_numbers<[1], [0], [0], [1], [0, 0, 1, 1], [], []>} : vector<1x32xf32>, vector<32x32xf32>, vector<1x32xf32> -> vector<1x32xf32>
    %49 = arith.addf %46, %48 : vector<1x32xf32>
    %c0_29 = arith.constant 0 : index
    %c0_30 = arith.constant 0 : index
    %50 = vector.load %arg8[%c0_29, %c0_30] : memref<1x32xf32, #tpu.memory_space<vmem>>, vector<1x32xf32>
    %51 = arith.addf %49, %50 : vector<1x32xf32>
    %52 = math.tanh %51 : vector<1x32xf32>
    %c0_31 = arith.constant 0 : index
    %c0_32 = arith.constant 0 : index
    %c0_33 = arith.constant 0 : index
    %53 = vector.load %arg9[%c0_31, %c0_32, %c0_33] : memref<1x1x32xf32, #tpu.memory_space<vmem>>, vector<1x1x32xf32>
    %54 = vector.shape_cast %53 : vector<1x1x32xf32> to vector<1x32xf32>
    %55 = vector.shape_cast %52 : vector<1x32xf32> to vector<1x1x32xf32>
    tpu.vector_store %arg9[%c0_31, %c0_32, %c0_33], %55 {strides = array<i32>} : memref<1x1x32xf32, #tpu.memory_space<vmem>>, vector<1x1x32xf32>,
    return
  }
  func.func @transform_0(%arg0: i32) -> (i32, i32, i32) {
    %c0_i32 = arith.constant 0 : i32
    %c0_i32_0 = arith.constant 0 : i32
    %c0_i32_1 = arith.constant 0 : i32
    return %arg0, %c0_i32, %c0_i32_0 : i32, i32, i32
  }
  func.func @transform_1(%arg0: i32) -> (i32, i32, i32) {
    %c0_i32 = arith.constant 0 : i32
    %c0_i32_0 = arith.constant 0 : i32
    %c0_i32_1 = arith.constant 0 : i32
    return %arg0, %c0_i32, %c0_i32_0 : i32, i32, i32
  }
  func.func @transform_2(%arg0: i32) -> (i32, i32) {
    %c0_i32 = arith.constant 0 : i32
    %c0_i32_0 = arith.constant 0 : i32
    %c0_i32_1 = arith.constant 0 : i32
    return %c0_i32, %c0_i32_0 : i32, i32
  }
  func.func @transform_3(%arg0: i32) -> (i32, i32) {
    %c0_i32 = arith.constant 0 : i32
    %c0_i32_0 = arith.constant 0 : i32
    %c0_i32_1 = arith.constant 0 : i32
    return %c0_i32, %c0_i32_0 : i32, i32
  }
  func.func @transform_4(%arg0: i32) -> (i32, i32) {
    %c0_i32 = arith.constant 0 : i32
    %c0_i32_0 = arith.constant 0 : i32
    %c0_i32_1 = arith.constant 0 : i32
    return %c0_i32, %c0_i32_0 : i32, i32
  }
  func.func @transform_5(%arg0: i32) -> (i32, i32) {
    %c0_i32 = arith.constant 0 : i32
    %c0_i32_0 = arith.constant 0 : i32
    %c0_i32_1 = arith.constant 0 : i32
    return %c0_i32, %c0_i32_0 : i32, i32
  }
  func.func @transform_6(%arg0: i32) -> (i32, i32) {
    %c0_i32 = arith.constant 0 : i32
    %c0_i32_0 = arith.constant 0 : i32
    %c0_i32_1 = arith.constant 0 : i32
    return %c0_i32, %c0_i32_0 : i32, i32
  }
  func.func @transform_7(%arg0: i32) -> (i32, i32) {
    %c0_i32 = arith.constant 0 : i32
    %c0_i32_0 = arith.constant 0 : i32
    %c0_i32_1 = arith.constant 0 : i32
    return %c0_i32, %c0_i32_0 : i32, i32
  }
  func.func @transform_8(%arg0: i32) -> (i32, i32, i32) {
    %c0_i32 = arith.constant 0 : i32
    %c0_i32_0 = arith.constant 0 : i32
    %c0_i32_1 = arith.constant 0 : i32
    return %arg0, %c0_i32, %c0_i32_0 : i32, i32, i32
  }
}

module attributes {stable_mosaic.version = 11 : i64} {
  func.func @_heads_kernel(%arg0: i32, %arg1: memref<2x32xf32, #tpu.memory_space<vmem>>, %arg2: memref<32x32xf32, #tpu.memory_space<vmem>>, %arg3: memref<1x32xf32, #tpu.memory_space<vmem>>, %arg4: memref<32x32xf32, #tpu.memory_space<vmem>>, %arg5: memref<1x32xf32, #tpu.memory_space<vmem>>, %arg6: memref<32x6xf32, #tpu.memory_space<vmem>>, %arg7: memref<1x6xf32, #tpu.memory_space<vmem>>, %arg8: memref<32x32xf32, #tpu.memory_space<vmem>>, %arg9: memref<1x32xf32, #tpu.memory_space<vmem>>, %arg10: memref<32x6xf32, #tpu.memory_space<vmem>>, %arg11: memref<1x6xf32, #tpu.memory_space<vmem>>, %arg12: memref<2x6xf32, #tpu.memory_space<vmem>>, %arg13: memref<2x6xf32, #tpu.memory_space<vmem>>) attributes {dimension_semantics = [#tpu.dimension_semantics<arbitrary>], iteration_bounds = array<i64: 1>, scalar_prefetch = 0 : i64, scratch_operands = 0 : i64, tpu.core_type = #tpu.core_type<tc>, window_params = [{pipeline_mode = #tpu.pipeline_mode<synchronous>, transform_indices = @transform_0, window_bounds = array<i64: 2, 32>}, {pipeline_mode = #tpu.pipeline_mode<synchronous>, transform_indices = @transform_1, window_bounds = array<i64: 32, 32>}, {pipeline_mode = #tpu.pipeline_mode<synchronous>, transform_indices = @transform_2, window_bounds = array<i64: 1, 32>}, {pipeline_mode = #tpu.pipeline_mode<synchronous>, transform_indices = @transform_3, window_bounds = array<i64: 32, 32>}, {pipeline_mode = #tpu.pipeline_mode<synchronous>, transform_indices = @transform_4, window_bounds = array<i64: 1, 32>}, {pipeline_mode = #tpu.pipeline_mode<synchronous>, transform_indices = @transform_5, window_bounds = array<i64: 32, 6>}, {pipeline_mode = #tpu.pipeline_mode<synchronous>, transform_indices = @transform_6, window_bounds = array<i64: 1, 6>}, {pipeline_mode = #tpu.pipeline_mode<synchronous>, transform_indices = @transform_7, window_bounds = array<i64: 32, 32>}, {pipeline_mode = #tpu.pipeline_mode<synchronous>, transform_indices = @transform_8, window_bounds = array<i64: 1, 32>}, {pipeline_mode = #tpu.pipeline_mode<synchronous>, transform_indices = @transform_9, window_bounds = array<i64: 32, 6>}, {pipeline_mode = #tpu.pipeline_mode<synchronous>, transform_indices = @transform_10, window_bounds = array<i64: 1, 6>}, {pipeline_mode = #tpu.pipeline_mode<synchronous>, transform_indices = @transform_11, window_bounds = array<i64: 2, 6>}, {pipeline_mode = #tpu.pipeline_mode<synchronous>, transform_indices = @transform_12, window_bounds = array<i64: 2, 6>}]} {
    %c0 = arith.constant 0 : index
    %c0_0 = arith.constant 0 : index
    %0 = vector.load %arg1[%c0, %c0_0] : memref<2x32xf32, #tpu.memory_space<vmem>>, vector<2x32xf32>
    %c0_1 = arith.constant 0 : index
    %c0_2 = arith.constant 0 : index
    %1 = vector.load %arg2[%c0_1, %c0_2] : memref<32x32xf32, #tpu.memory_space<vmem>>, vector<32x32xf32>
    %cst = arith.constant dense<0.000000e+00> : vector<2x32xf32>
    %2 = tpu.matmul %0, %1, %cst {dimension_numbers = #tpu.dot_dimension_numbers<[1], [0], [0], [1], [0, 0, 1, 1], [], []>} : vector<2x32xf32>, vector<32x32xf32>, vector<2x32xf32> -> vector<2x32xf32>
    %c0_3 = arith.constant 0 : index
    %c0_4 = arith.constant 0 : index
    %3 = vector.load %arg3[%c0_3, %c0_4] : memref<1x32xf32, #tpu.memory_space<vmem>>, vector<1x32xf32>
    %4 = vector.broadcast %3 : vector<1x32xf32> to vector<2x32xf32>
    %5 = arith.addf %2, %4 : vector<2x32xf32>
    %cst_5 = arith.constant 0.000000e+00 : f32
    %6 = vector.broadcast %cst_5 : f32 to vector<2x32xf32>
    %7 = arith.maximumf %5, %6 : vector<2x32xf32>
    %c0_6 = arith.constant 0 : index
    %c0_7 = arith.constant 0 : index
    %8 = vector.load %arg4[%c0_6, %c0_7] : memref<32x32xf32, #tpu.memory_space<vmem>>, vector<32x32xf32>
    %cst_8 = arith.constant dense<0.000000e+00> : vector<2x32xf32>
    %9 = tpu.matmul %7, %8, %cst_8 {dimension_numbers = #tpu.dot_dimension_numbers<[1], [0], [0], [1], [0, 0, 1, 1], [], []>} : vector<2x32xf32>, vector<32x32xf32>, vector<2x32xf32> -> vector<2x32xf32>
    %c0_9 = arith.constant 0 : index
    %c0_10 = arith.constant 0 : index
    %10 = vector.load %arg5[%c0_9, %c0_10] : memref<1x32xf32, #tpu.memory_space<vmem>>, vector<1x32xf32>
    %11 = vector.broadcast %10 : vector<1x32xf32> to vector<2x32xf32>
    %12 = arith.addf %9, %11 : vector<2x32xf32>
    %cst_11 = arith.constant 0.000000e+00 : f32
    %13 = vector.broadcast %cst_11 : f32 to vector<2x32xf32>
    %14 = arith.maximumf %12, %13 : vector<2x32xf32>
    %c0_12 = arith.constant 0 : index
    %c0_13 = arith.constant 0 : index
    %15 = vector.load %arg6[%c0_12, %c0_13] : memref<32x6xf32, #tpu.memory_space<vmem>>, vector<32x6xf32>
    %cst_14 = arith.constant dense<0.000000e+00> : vector<2x6xf32>
    %16 = tpu.matmul %14, %15, %cst_14 {dimension_numbers = #tpu.dot_dimension_numbers<[1], [0], [0], [1], [0, 0, 1, 1], [], []>} : vector<2x32xf32>, vector<32x6xf32>, vector<2x6xf32> -> vector<2x6xf32>
    %c0_15 = arith.constant 0 : index
    %c0_16 = arith.constant 0 : index
    %17 = vector.load %arg7[%c0_15, %c0_16] : memref<1x6xf32, #tpu.memory_space<vmem>>, vector<1x6xf32>
    %18 = vector.broadcast %17 : vector<1x6xf32> to vector<2x6xf32>
    %19 = arith.addf %16, %18 : vector<2x6xf32>
    %c0_17 = arith.constant 0 : index
    %c0_18 = arith.constant 0 : index
    %20 = vector.load %arg12[%c0_17, %c0_18] : memref<2x6xf32, #tpu.memory_space<vmem>>, vector<2x6xf32>
    tpu.vector_store %arg12[%c0_17, %c0_18], %19 {strides = array<i32>} : memref<2x6xf32, #tpu.memory_space<vmem>>, vector<2x6xf32>,
    %c0_19 = arith.constant 0 : index
    %c0_20 = arith.constant 0 : index
    %21 = vector.load %arg8[%c0_19, %c0_20] : memref<32x32xf32, #tpu.memory_space<vmem>>, vector<32x32xf32>
    %cst_21 = arith.constant dense<0.000000e+00> : vector<2x32xf32>
    %22 = tpu.matmul %0, %21, %cst_21 {dimension_numbers = #tpu.dot_dimension_numbers<[1], [0], [0], [1], [0, 0, 1, 1], [], []>} : vector<2x32xf32>, vector<32x32xf32>, vector<2x32xf32> -> vector<2x32xf32>
    %c0_22 = arith.constant 0 : index
    %c0_23 = arith.constant 0 : index
    %23 = vector.load %arg9[%c0_22, %c0_23] : memref<1x32xf32, #tpu.memory_space<vmem>>, vector<1x32xf32>
    %24 = vector.broadcast %23 : vector<1x32xf32> to vector<2x32xf32>
    %25 = arith.addf %22, %24 : vector<2x32xf32>
    %26 = math.tanh %25 : vector<2x32xf32>
    %c0_24 = arith.constant 0 : index
    %c0_25 = arith.constant 0 : index
    %27 = vector.load %arg10[%c0_24, %c0_25] : memref<32x6xf32, #tpu.memory_space<vmem>>, vector<32x6xf32>
    %cst_26 = arith.constant dense<0.000000e+00> : vector<2x6xf32>
    %28 = tpu.matmul %26, %27, %cst_26 {dimension_numbers = #tpu.dot_dimension_numbers<[1], [0], [0], [1], [0, 0, 1, 1], [], []>} : vector<2x32xf32>, vector<32x6xf32>, vector<2x6xf32> -> vector<2x6xf32>
    %c0_27 = arith.constant 0 : index
    %c0_28 = arith.constant 0 : index
    %29 = vector.load %arg11[%c0_27, %c0_28] : memref<1x6xf32, #tpu.memory_space<vmem>>, vector<1x6xf32>
    %30 = vector.broadcast %29 : vector<1x6xf32> to vector<2x6xf32>
    %31 = arith.addf %28, %30 : vector<2x6xf32>
    %c0_29 = arith.constant 0 : index
    %c0_30 = arith.constant 0 : index
    %32 = vector.load %arg13[%c0_29, %c0_30] : memref<2x6xf32, #tpu.memory_space<vmem>>, vector<2x6xf32>
    tpu.vector_store %arg13[%c0_29, %c0_30], %31 {strides = array<i32>} : memref<2x6xf32, #tpu.memory_space<vmem>>, vector<2x6xf32>,
    return
  }
  func.func @transform_0(%arg0: i32) -> (i32, i32) {
    %c0_i32 = arith.constant 0 : i32
    %c0_i32_0 = arith.constant 0 : i32
    %c0_i32_1 = arith.constant 0 : i32
    return %c0_i32, %c0_i32_0 : i32, i32
  }
  func.func @transform_1(%arg0: i32) -> (i32, i32) {
    %c0_i32 = arith.constant 0 : i32
    %c0_i32_0 = arith.constant 0 : i32
    %c0_i32_1 = arith.constant 0 : i32
    return %c0_i32, %c0_i32_0 : i32, i32
  }
  func.func @transform_2(%arg0: i32) -> (i32, i32) {
    %c0_i32 = arith.constant 0 : i32
    %c0_i32_0 = arith.constant 0 : i32
    %c0_i32_1 = arith.constant 0 : i32
    return %c0_i32, %c0_i32_0 : i32, i32
  }
  func.func @transform_3(%arg0: i32) -> (i32, i32) {
    %c0_i32 = arith.constant 0 : i32
    %c0_i32_0 = arith.constant 0 : i32
    %c0_i32_1 = arith.constant 0 : i32
    return %c0_i32, %c0_i32_0 : i32, i32
  }
  func.func @transform_4(%arg0: i32) -> (i32, i32) {
    %c0_i32 = arith.constant 0 : i32
    %c0_i32_0 = arith.constant 0 : i32
    %c0_i32_1 = arith.constant 0 : i32
    return %c0_i32, %c0_i32_0 : i32, i32
  }
  func.func @transform_5(%arg0: i32) -> (i32, i32) {
    %c0_i32 = arith.constant 0 : i32
    %c0_i32_0 = arith.constant 0 : i32
    %c0_i32_1 = arith.constant 0 : i32
    return %c0_i32, %c0_i32_0 : i32, i32
  }
  func.func @transform_6(%arg0: i32) -> (i32, i32) {
    %c0_i32 = arith.constant 0 : i32
    %c0_i32_0 = arith.constant 0 : i32
    %c0_i32_1 = arith.constant 0 : i32
    return %c0_i32, %c0_i32_0 : i32, i32
  }
  func.func @transform_7(%arg0: i32) -> (i32, i32) {
    %c0_i32 = arith.constant 0 : i32
    %c0_i32_0 = arith.constant 0 : i32
    %c0_i32_1 = arith.constant 0 : i32
    return %c0_i32, %c0_i32_0 : i32, i32
  }
  func.func @transform_8(%arg0: i32) -> (i32, i32) {
    %c0_i32 = arith.constant 0 : i32
    %c0_i32_0 = arith.constant 0 : i32
    %c0_i32_1 = arith.constant 0 : i32
    return %c0_i32, %c0_i32_0 : i32, i32
  }
  func.func @transform_9(%arg0: i32) -> (i32, i32) {
    %c0_i32 = arith.constant 0 : i32
    %c0_i32_0 = arith.constant 0 : i32
    %c0_i32_1 = arith.constant 0 : i32
    return %c0_i32, %c0_i32_0 : i32, i32
  }
  func.func @transform_10(%arg0: i32) -> (i32, i32) {
    %c0_i32 = arith.constant 0 : i32
    %c0_i32_0 = arith.constant 0 : i32
    %c0_i32_1 = arith.constant 0 : i32
    return %c0_i32, %c0_i32_0 : i32, i32
  }
  func.func @transform_11(%arg0: i32) -> (i32, i32) {
    %c0_i32 = arith.constant 0 : i32
    %c0_i32_0 = arith.constant 0 : i32
    %c0_i32_1 = arith.constant 0 : i32
    return %c0_i32, %c0_i32_0 : i32, i32
  }
  func.func @transform_12(%arg0: i32) -> (i32, i32) {
    %c0_i32 = arith.constant 0 : i32
    %c0_i32_0 = arith.constant 0 : i32
    %c0_i32_1 = arith.constant 0 : i32
    return %c0_i32, %c0_i32_0 : i32, i32
  }
}

</mosaic_0001>

<bundles_post_ra>
// kernel: _lambda_.13
= control target key start
LH: loop header
LB: loop body
LE: loop exit
PB: predicated region body
PF: predicated region fallthrough
CT: control target
= control target key end

     0   :  { %s301_s12 = smov 0   ;;  %s327_s0 = inlined_call_operand.vmem [shape: f32[16,32], index: 0, kind: input, shape index: {}]   ;;  %s328_s1 = inlined_call_operand.vmem [shape: f32[1,32], index: 1, kind: input, shape index: {}]   ;;  %s329_s2 = inlined_call_operand.vmem [shape: f32[1,32], index: 2, kind: input, shape index: {}]   ;;  %s330_s3 = inlined_call_operand.vmem [shape: f32[16,32], index: 3, kind: output, shape index: {}]  }
   0x1 LB: > { %s252_s13 = sadd.s32 4294967295, %s279_s12   ;;  %p256_p0 = scmp.ge.s32.totalorder %s279_s12, 1  ;;  %s279_s12 = sphi %s301_s12, %s13_s12  }
   0x2   : > { %p136_p1 = scmp.lt.s32.totalorder %s279_s12, 3 }
   0x4   : > { %p137_p2 = pnand %p256_p0, %p136_p1 }
   0x5   : > { %p158_p3 = scmp.lt.s32.totalorder (!%p137_p2), %s252_s13, 1  ;;  %vm167_vm0 = vcmask (!%p137_p2), 261120   ;;  %v259_v11 = vld [vmem:[%s328_s1] ss:$0 sm:$0xff] (!%p137_p2) }
   0x6   : > { %140 = sbr.rel (%p137_p2) target bundleno = 331 (0x14b), region = 32  ;;  %v260_v13 = vld [vmem:[%s329_s2] ss:$0 sm:$0xff] (!%p137_p2) }
   0xd   : > { %s332_s13 = smov (!%p158_p3, %s252_s13), 1 }
   0xe   : > { %s257_s14 = sshll.u32 %s332_s13, 3 }
   0xf   : > { %s161_s17 = scalar_lea.vmem %s327_s0, %s257_s14  ;;  %s165_s24 = scalar_lea.vmem %s330_s3, %s257_s14 }
  0x10   : > { %v166_v0 = vld [vmem:[%s161_s17] sm:$0xff] }
  0x11   : > { %v168_v1 = vsel %vm167_vm0, %v166_v0, 0.0 }
  0x12   : > { %169 = vadd.xlane.f32.xlu0 %v168_v1 }
  0x9f   : > { %v170_v2 = vpop.xlane.xlu0 %169 }
  0xa0   : > { %v172_v3 = vmul.f32 0.03125, %v170_v2 }
  0xa2   : > { %v173_v4 = vsub.f32 %v166_v0, %v172_v3 }
  0xa4   : > { %v174_v5 = vmul.f32 %v173_v4, %v173_v4 }
  0xa6   : > { %v175_v6 = vsel %vm167_vm0, %v174_v5, 0.0 }
  0xa7   : > { %176 = vadd.xlane.f32.xlu0 %v175_v6 }
 0x134   : > { %v177_v7 = vpop.xlane.xlu0 %176 }
 0x135   : > { %v178_v8 = vmul.f32 0.03125, %v177_v7 }
 0x137   : > { %v179_v9 = vadd.f32 1e-12, %v178_v8 }
 0x139   : > { %271 = vrsqrt.f32 %v179_v9 }
 0x143   : > { %v272_v10 = vpop.eup %271 }
 0x144   : > { %v181_v12 = vmul.f32 %v272_v10, %v173_v4 }
 0x146   : > { %v189_v14 = vmul.f32 %v259_v11, %v181_v12 }
 0x148   : > { %v197_v15 = vadd.f32 %v260_v13, %v189_v14 }
 0x14a   : > { %198 = vst.msk [vmem:[%s165_s24] sm:$0xff] %vm167_vm0, %v197_v15 }
 0x14b PF: > { %s13_s12 = sadd.s32 1, %s279_s12  }
 0x14c   : > { %p10_p4 = scmp.ge.s32.totalorder %s13_s12, 4  }
 0x14e   :  { %12 = sbr.rel (!%p10_p4) target bundleno = 1 (0x1), region = 62 }

// kernel: _lambda_.16
= control target key start
LH: loop header
LB: loop body
LE: loop exit
PB: predicated region body
PF: predicated region fallthrough
CT: control target
= control target key end

     0   :  { %s662_s21 = smov 0   ;;  %s664_s22 = smov 0   ;;  %s730_s0 = inlined_call_operand.vmem [shape: f32[16,32], index: 0, kind: input, shape index: {}]   ;;  %s731_s1 = inlined_call_operand.vmem [shape: f32[32,32], index: 1, kind: input, shape index: {}]   ;;  %s732_s2 = inlined_call_operand.vmem [shape: f32[1,32], index: 2, kind: input, shape index: {}]   ;;  %s733_s3 = inlined_call_operand.vmem [shape: f32[16,32], index: 3, kind: input, shape index: {}]   ;;  %s734_s4 = inlined_call_operand.vmem [shape: f32[1,32], index: 4, kind: input, shape index: {}]   ;;  %s735_s5 = inlined_call_operand.vmem [shape: f32[1,32], index: 5, kind: input, shape index: {}]   ;;  %s736_s6 = inlined_call_operand.vmem [shape: f32[16,32], index: 6, kind: output, shape index: {}]  }
   0x1   :  { %s666_s23 = smov 0  }
   0x2 LB: > { %s28_s24 = sadd.s32 1, %s618_s22  ;;  %p539_p0 = scmp.ge.s32.totalorder %s622_s23, 1  ;;  %s622_s23 = sphi %s666_s23, %s16_s23   ;;  %s618_s22 = sphi %s664_s22, %s738_s22   ;;  %s614_s21 = sphi %s662_s21, %s737_s21  }
   0x3   : > { %p30_p1 = scmp.ge.s32.totalorder %s28_s24, 2  ;;  %p248_p2 = scmp.lt.s32.totalorder %s622_s23, 3 }
   0x5   : > { %s740_s24 = smov (%p30_p1, %s28_s24), 0  ;;  %p249_p3 = pnand %p539_p0, %p248_p2 }
   0x6   : > { %v317_v0 = vld [vmem:[%s731_s1] sm:$0xff] (!%p249_p3)  ;;  %v318_v1 = vld [vmem:[%s731_s1 + $0x8] sm:$0xff] (!%p249_p3)  ;;  %v319_v2 = vld [vmem:[%s731_s1 + $0x10] sm:$0xff] (!%p249_p3)  ;;  %vm313_vm0 = vcmask (!%p249_p3), 261120   ;;  %v624_v3 = vmov (!%p249_p3), 0.0|0.0   ;;  %v625_v6 = vmov (!%p249_p3), 0.0  }
   0x7   : > { %252 = sbr.rel (%p249_p3) target bundleno = 558 (0x22e), region = 44  ;;  %565 = vmatprep.subr.bf16.mxu0 (!%p249_p3), %v624_v3  ;;  %v566_v4 = vpack.c.bf16 (!%p249_p3), %v318_v1, %v317_v0  ;;  %v320_v5 = vld [vmem:[%s731_s1 + $0x18] sm:$0xff] (!%p249_p3)  ;;  %314 = vst.msk [vmem:[#allocation2] sm:$0xff] (!%p249_p3), %vm313_vm0, %v625_v6  ;;  %p288_p4 = scmp.lt.s32.totalorder (!%p249_p3), %s614_s21, 1  ;;  %vm626_vm1 = vmmov (!%p249_p3), 0  }
   0x8   : > { %562 = vmatprep.mubr.msk.f32.mxu0 (!%p249_p3), %vm626_vm1, %v625_v6  ;;  %v569_v7 = vpack.c.bf16 (!%p249_p3), %v320_v5, %v319_v2  ;;  %v544_v13 = vld [vmem:[%s732_s2] ss:$0 sm:$0xff] (!%p249_p3) }
   0x9   : > { %567 = vmatpush3.bf16.msra.mxu0 (!%p249_p3), %v566_v4  ;;  %v545_v28 = vld [vmem:[%s734_s4] ss:$0 sm:$0xff] (!%p249_p3) }
   0xa   : > { %568 = vmatprep.subr.bf16.mxu0 (!%p249_p3), %v624_v3  ;;  %v546_v30 = vld [vmem:[%s735_s5] ss:$0 sm:$0xff] (!%p249_p3) }
   0xd   : > { %570 = vmatpush3.bf16.msra.mxu0 (!%p249_p3), %v569_v7 }
   0xe   : > { %s742_s21 = smov (!%p288_p4, %s614_s21), 1  ;;  %v315_v9 = vld [vmem:[#allocation2] sm:$0xff] }
   0xf   : > { %s693_s9 = sshll.u32 %s742_s21, 3 }
  0x10   : > { %s294_s12 = scalar_lea.vmem %s730_s0, %s693_s9  ;;  %s304_s15 = scalar_lea.vmem %s733_s3, %s693_s9 }
  0x11   : > { %v316_v8 = vld [vmem:[%s294_s12] sm:$0xff]  ;;  %s308_s27 = scalar_lea.vmem %s736_s6, %s693_s9 }
  0x12   : > { %563 = vmatmul.mubr.msk.f32.vlgmr.msra.gmra.mrb[0].mxu0 %vm313_vm0, %v316_v8  ;;  %v409_v15 = vld [vmem:[%s304_s15] sm:$0xff] }
  0xe5   : > { %v391_v10 = vpop.f32.mrb[0].mxu0 }
  0xe6   : > { %v395_v11 = vadd.f32 %v391_v10, %v315_v9  ;;  %v564_v12 = vpop.f32.mrb[1].mxu0 }
  0xe8   : > { %396 = vst.msk [vmem:[#allocation2] sm:$0xff] %vm313_vm0, %v395_v11 }
  0xef   : > { %v400_v14 = vld [vmem:[#allocation2] sm:$0xff] }
  0xf0   : > { %v408_v16 = vadd.f32 %v544_v13, %v400_v14 }
  0xf2   : > { %v410_v17 = vadd.f32 %v409_v15, %v408_v16 }
  0xf4   : > { %v411_v18 = vsel %vm313_vm0, %v410_v17, 0.0 }
  0xf5   : > { %412 = vadd.xlane.f32.xlu0 %v411_v18 }
 0x182   : > { %v413_v19 = vpop.xlane.xlu0 %412 }
 0x183   : > { %v415_v20 = vmul.f32 0.03125, %v413_v19 }
 0x185   : > { %v416_v21 = vsub.f32 %v410_v17, %v415_v20 }
 0x187   : > { %v417_v22 = vmul.f32 %v416_v21, %v416_v21 }
 0x189   : > { %v418_v23 = vsel %vm313_vm0, %v417_v22, 0.0 }
 0x18a   : > { %419 = vadd.xlane.f32.xlu0 %v418_v23 }
 0x217   : > { %v420_v24 = vpop.xlane.xlu0 %419 }
 0x218   : > { %v421_v25 = vmul.f32 0.03125, %v420_v24 }
 0x21a   : > { %v422_v26 = vadd.f32 1e-12, %v421_v25 }
 0x21c   : > { %598 = vrsqrt.f32 %v422_v26 }
 0x226   : > { %v599_v27 = vpop.eup %598 }
 0x227   : > { %v424_v29 = vmul.f32 %v599_v27, %v416_v21 }
 0x229   : > { %v432_v31 = vmul.f32 %v545_v28, %v424_v29 }
 0x22b   : > { %v440_v32 = vadd.f32 %v546_v30, %v432_v31 }
 0x22d   : > { %441 = vst.msk [vmem:[%s308_s27] sm:$0xff] %vm313_vm0, %v440_v32 }
 0x22e PF: > { %s16_s23 = sadd.s32 1, %s622_s23   ;;  %s737_s21 = smov %s618_s22 }
 0x22f   : > { %p13_p5 = scmp.ge.s32.totalorder %s16_s23, 4   ;;  %s738_s22 = smov %s740_s24 }
 0x231   :  { %15 = sbr.rel (!%p13_p5) target bundleno = 2 (0x2), region = 88 }

// kernel: _lambda_.14
= control target key start
LH: loop header
LB: loop body
LE: loop exit
PB: predicated region body
PF: predicated region fallthrough
CT: control target
= control target key end

     0   :  { %s570_s12 = smov 0   ;;  %s572_s13 = smov 0   ;;  %s621_s0 = inlined_call_operand.vmem [shape: f32[16,32], index: 0, kind: input, shape index: {}]   ;;  %s622_s1 = inlined_call_operand.vmem [shape: f32[32,96], index: 1, kind: input, shape index: {}]   ;;  %s623_s2 = inlined_call_operand.vmem [shape: f32[1,96], index: 2, kind: input, shape index: {}]   ;;  %s624_s3 = inlined_call_operand.vmem [shape: f32[16,96], index: 3, kind: output, shape index: {}]  }
   0x1   :  { %s574_s14 = smov 0  }
   0x2 LB: > { %s32_s15 = sadd.s32 1, %s541_s13  ;;  %p467_p0 = scmp.ge.s32.totalorder %s545_s14, 1  ;;  %s545_s14 = sphi %s574_s14, %s13_s14   ;;  %s541_s13 = sphi %s572_s13, %s626_s13   ;;  %s537_s12 = sphi %s570_s12, %s625_s12  }
   0x3   : > { %p34_p1 = scmp.ge.s32.totalorder %s32_s15, 2  ;;  %p186_p2 = scmp.lt.s32.totalorder %s545_s14, 3 }
   0x5   : > { %s628_s15 = smov (%p34_p1, %s32_s15), 0  ;;  %p187_p3 = pnand %p467_p0, %p186_p2 }
   0x6   : > { %v259_v0 = vld [vmem:[%s622_s1] sm:$0xff] (!%p187_p3)  ;;  %v260_v1 = vld [vmem:[%s622_s1 + $0x8] sm:$0xff] (!%p187_p3)  ;;  %v261_v2 = vld [vmem:[%s622_s1 + $0x10] sm:$0xff] (!%p187_p3)  ;;  %vm255_vm0 = vcmask (!%p187_p3), 785408   ;;  %v547_v3 = vmov (!%p187_p3), 0.0|0.0   ;;  %v548_v6 = vmov (!%p187_p3), 0.0  }
   0x7   : > { %190 = sbr.rel (%p187_p3) target bundleno = 243 (0xf3), region = 32  ;;  %490 = vmatprep.subr.bf16.mxu0 (!%p187_p3), %v547_v3  ;;  %v491_v4 = vpack.c.bf16 (!%p187_p3), %v260_v1, %v259_v0  ;;  %v262_v5 = vld [vmem:[%s622_s1 + $0x18] sm:$0xff] (!%p187_p3)  ;;  %256 = vst.msk [vmem:[#allocation2] sm:$0xff] (!%p187_p3), %vm255_vm0, %v548_v6  ;;  %p225_p4 = scmp.lt.s32.totalorder (!%p187_p3), %s537_s12, 1  ;;  %vm549_vm1 = vmmov (!%p187_p3), 0   ;;  %vm263_vm2 = vcmask (!%p187_p3), 261120  }
   0x8   : > { %487 = vmatprep.mubr.msk.f32.mxu0 (!%p187_p3), %vm549_vm1, %v548_v6  ;;  %v494_v7 = vpack.c.bf16 (!%p187_p3), %v262_v5, %v261_v2  ;;  %v471_v13 = vld [vmem:[%s623_s2] ss:$0 sm:$0xff] (!%p187_p3) }
   0x9   : > { %492 = vmatpush3.bf16.msra.mxu0 (!%p187_p3), %v491_v4 }
   0xa   : > { %493 = vmatprep.subr.bf16.mxu0 (!%p187_p3), %v547_v3 }
   0xd   : > { %495 = vmatpush3.bf16.msra.mxu0 (!%p187_p3), %v494_v7 }
   0xe   : > { %s630_s12 = smov (!%p225_p4, %s537_s12), 1  ;;  %v257_v9 = vld [vmem:[#allocation2] sm:$0xff] }
   0xf   : > { %s468_s24 = sshll.u32 %s630_s12, 3 }
  0x10   : > { %s231_s27 = scalar_lea.vmem %s621_s0, %s468_s24  ;;  %s250_s5 = scalar_lea.vmem %s624_s3, %s468_s24 }
  0x11   : > { %v258_v8 = vld [vmem:[%s231_s27] sm:$0xff] }
  0x12   : > { %488 = vmatmul.mubr.msk.f32.vlgmr.msra.gmra.mrb[0].mxu0 %vm263_vm2, %v258_v8 }
  0xe5   : > { %v333_v10 = vpop.f32.mrb[0].mxu0 }
  0xe6   : > { %v337_v11 = vadd.f32 %v333_v10, %v257_v9  ;;  %v489_v12 = vpop.f32.mrb[1].mxu0 }
  0xe8   : > { %339 = vst.msk [vmem:[#allocation2] sm:$0xff] %vm255_vm0, %v337_v11 }
  0xef   : > { %v343_v14 = vld [vmem:[#allocation2] sm:$0xff] }
  0xf0   : > { %v351_v15 = vadd.f32 %v471_v13, %v343_v14 }
  0xf2   : > { %352 = vst.msk [vmem:[%s250_s5] sm:$0xff] %vm255_vm0, %v351_v15 }
  0xf3 PF: > { %s13_s14 = sadd.s32 1, %s545_s14   ;;  %s625_s12 = smov %s541_s13 }
  0xf4   : > { %p10_p5 = scmp.ge.s32.totalorder %s13_s14, 4   ;;  %s626_s13 = smov %s628_s15 }
  0xf6   :  { %12 = sbr.rel (!%p10_p5) target bundleno = 2 (0x2), region = 76 }

// kernel: _lambda_.15
= control target key start
LH: loop header
LB: loop body
LE: loop exit
PB: predicated region body
PF: predicated region fallthrough
CT: control target
= control target key end

     0   :  { %s1067_s9 = smov 0   ;;  %s1157_s0 = inlined_call_operand.vmem [shape: f32[2,8,96], index: 0, kind: input, shape index: {}]   ;;  %s1158_s1 = inlined_call_operand.vmem [shape: f32[2,1,8], index: 1, kind: input, shape index: {}]   ;;  %s1159_s2 = inlined_call_operand.vmem [shape: f32[2,8,32], index: 2, kind: output, shape index: {}]  }
   0x1 LB: > { %s910_s10 = sadd.s32 4294967295, %s1034_s9   ;;  %p914_p0 = scmp.ge.s32.totalorder %s1034_s9, 1  ;;  %s1034_s9 = sphi %s1067_s9, %s12_s9  }
   0x2   : > { %p119_p1 = scmp.lt.s32.totalorder %s1034_s9, 3 }
   0x4   : > { %p120_p2 = pnand %p914_p0, %p119_p1 }
   0x5   : > { %p142_p3 = scmp.lt.s32.totalorder (!%p120_p2), %s910_s10, 1  ;;  %v1036_v0 = vmov (!%p120_p2), 0.0   ;;  %vm1037_vm0 = vmmov (!%p120_p2), 0   ;;  %s1038_s15 = smov (!%p120_p2), 96   ;;  %vm158_vm1 = vcmask (!%p120_p2), 64512   ;;  %vm842_vm2 = vcmask (!%p120_p2), 130048  }
   0x6   : > { %123 = sbr.rel (%p120_p2) target bundleno = 1536 (0x600), region = 28  ;;  %948 = vmatprep.subr.mxu0 (!%p120_p2), %v1036_v0  ;;  %950 = vmatprep.mubr.msk.f32.mxu0 (!%p120_p2), %vm1037_vm0, %v1036_v0  ;;  %s1039_s16 = smov (!%p120_p2), 64   ;;  %vm844_vm3 = vcmask (!%p120_p2), 195584   ;;  %vm846_vm4 = vcmask (!%p120_p2), 261120  }
   0x7   : > { %953 = vmatprep.subr.mxu1 (!%p120_p2), %v1036_v0  ;;  %955 = vmatprep.mubr.msk.f32.mxu1 (!%p120_p2), %vm1037_vm0, %v1036_v0  ;;  %s1040_s17 = smov (!%p120_p2), 88   ;;  %s1041_s18 = smov (!%p120_p2), 120  }
   0x8   : > { %s1042_s19 = smov (!%p120_p2), 80   ;;  %s1043_s23 = smov (!%p120_p2), 72  }
   0x9   : > { %s1044_s24 = smov (!%p120_p2), 112   ;;  %s1045_s25 = smov (!%p120_p2), 104  }
   0xa   : > { %s1046_s26 = smov (!%p120_p2), 56   ;;  %s1047_s27 = smov (!%p120_p2), 40  }
   0xb   : > { %s1048_s28 = smov (!%p120_p2), 48   ;;  %s1049_s29 = smov (!%p120_p2), 8  }
   0xc   : > { %s1050_s30 = smov (!%p120_p2), 16   ;;  %s1051_s3 = smov (!%p120_p2), 24  }
   0xd   : > { %s1161_s10 = smov (!%p142_p3, %s910_s10), 1 }
   0xe   : > { %s915_s11 = sshll.u32 %s1161_s10, 3  ;;  %s148_s22 = scalar_lea.vmem %s1158_s1, %s1161_s10 }
   0xf   : > { %s145_s14 = scalar_lea.vmem %s1157_s0, %s915_s11  ;;  %v919_v4 = vld [vmem:[%s148_s22] ss:$0 sm:$0xff]  ;;  %s152_s6 = scalar_lea.vmem %s1159_s2, %s915_s11 }
  0x10   : > { %v1089_v1 = vld [vmem:[%s145_s14] sm:$0xff] }
  0x11   : > { %156 = vrot.lane.b32.xlu0 %v1089_v1, %s1038_s15  ;;  %252 = vrot.lane.b32.xlu1 %v1089_v1, %s1039_s16 }
  0x15   : > { %330 = vrot.lane.b32.xlu1 %v1089_v1, %s1040_s17 }
  0x19   : > { %328 = vrot.lane.b32.xlu1 %v1089_v1, %s1041_s18 }
  0x1d   : > { %497 = vrot.lane.b32.xlu1 %v1089_v1, %s1042_s19 }
  0x83   : > { %v157_v2 = vpop.permute.xlu0 %156  ;;  %v253_v9 = vpop.permute.xlu1 %252 }
  0x84   : > { %949 = vmatpush3.xpose.msk.msra.mxu0 %vm158_vm1, %v157_v2  ;;  %954 = vmatpush3.msra.mxu1 %v253_v9 }
  0x85   : > { %963 = vmatprep.subr.mxu0 %v1036_v0  ;;  %958 = vmatprep.subr.mxu1 %v1036_v0 }
  0x87   : > { %951 = vmatmul.mubr.msk.f32.vlgmr.msra.gmra.mrb[0].mxu0 %vm158_vm1, %v1089_v1  ;;  %v331_v15 = vpop.permute.xlu1 %330 }
  0x88   : > { %965 = vmatprep.mubr.msk.f32.mxu0 %vm1037_vm0, %v1036_v0 }
  0x8b   : > { %v329_v16 = vpop.permute.xlu1 %328 }
  0x8f   : > { %v498_v17 = vpop.permute.xlu1 %497 }
 0x15a   : > { %v229_v3 = vpop.f32.mrb[0].mxu0 }
 0x15b   : > { %v233_v5 = vmul.f32 0.35355338, %v229_v3  ;;  %v952_v6 = vpop.f32.mrb[1].mxu0 }
 0x15d   : > { %v240_v7 = vadd.f32 %v919_v4, %v233_v5 }
 0x15f   : > { %v241_v8 = vsel %vm158_vm1, %v240_v7, -inf }
 0x160   : > { %242 = vmax.xlane.f32.xlu0 %v241_v8 }
 0x176   : > { %664 = vrot.lane.b32.xlu0 %v1089_v1, %s1043_s23 }
 0x1ed   : > { %v243_v10 = vpop.xlane.xlu0 %242 }
 0x1ee   : > { %v244_v11 = vsub.f32 %v240_v7, %v243_v10 }
 0x1f0   : > { %v245_v12 = vmul.f32 1.442695, %v244_v11 }
 0x1f1   : > { %v665_v22 = vpop.permute.xlu0 %664 }
 0x1f2   : > { %1012 = vpow2.f32 %v245_v12 }
 0x1fc   : > { %v1013_v13 = vpop.eup %1012 }
 0x1fd   : > { %v247_v14 = vsel %vm158_vm1, %v1013_v13, 0.0 }
 0x1fe   : > { %248 = vadd.xlane.f32.xlu1 %v247_v14 }
 0x20f   : > { %495 = vrot.lane.b32.xlu1 %v1089_v1, %s1044_s24 }
 0x213   : > { %662 = vrot.lane.b32.xlu1 %v1089_v1, %s1045_s25 }
 0x28b   : > { %v249_v18 = vpop.xlane.xlu1 %248 }
 0x28c   : > { %1014 = vrcp.f32 %v249_v18 }
 0x28f   : > { %v496_v21 = vpop.permute.xlu1 %495 }
 0x293   : > { %v663_v23 = vpop.permute.xlu1 %662 }
 0x296   : > { %v1015_v19 = vpop.eup %1014 }
 0x297   : > { %v251_v20 = vmul.f32 %v1015_v19, %v1013_v13 }
 0x299   : > { %956 = vmatmul.mubr.msk.f32.vlgmr.msra.gmra.mrb[0].mxu1 %vm158_vm1, %v251_v20 }
 0x29a   : > { %959 = vmatpush3.xpose.msk.msra.mxu1 %vm158_vm1, %v331_v15  ;;  %960 = vmatprep.mubr.msk.f32.mxu1 %vm1037_vm0, %v1036_v0 }
 0x29b   : > { %968 = vmatprep.subr.mxu1 %v1036_v0 }
 0x29d   : > { %961 = vmatmul.mubr.msk.f32.vlgmr.msra.gmra.mrb[2].mxu1 %vm158_vm1, %v329_v16 }
 0x29e   : > { %969 = vmatpush3.xpose.msk.msra.mxu1 %vm158_vm1, %v498_v17  ;;  %970 = vmatprep.mubr.msk.f32.mxu1 %vm1037_vm0, %v1036_v0 }
 0x29f   : > { %978 = vmatprep.subr.mxu1 %v1036_v0 }
 0x2a1   : > { %971 = vmatmul.mubr.msk.f32.vlgmr.msra.gmra.mrb[4].mxu1 %vm158_vm1, %v496_v21 }
 0x2a2   : > { %979 = vmatpush3.xpose.msk.msra.mxu1 %vm158_vm1, %v665_v22  ;;  %980 = vmatprep.mubr.msk.f32.mxu1 %vm1037_vm0, %v1036_v0 }
 0x2a5   : > { %981 = vmatmul.mubr.msk.f32.vlgmr.msra.gmra.mrb[6].mxu1 %vm158_vm1, %v663_v23 }
 0x36c   : > { %v1127_v24 = vpop.f32.mrb[0].mxu1 }
 0x36d   : > { %v957_v25 = vpop.f32.mrb[1].mxu1 }
 0x370   : > { %v402_v26 = vpop.f32.mrb[2].mxu1 }
 0x371   : > { %v406_v27 = vmul.f32 0.35355338, %v402_v26  ;;  %v962_v28 = vpop.f32.mrb[3].mxu1 }
 0x373   : > { %v407_v29 = vadd.f32 %v919_v4, %v406_v27 }
 0x374   : > { %v569_v30 = vpop.f32.mrb[4].mxu1 }
 0x375   : > { %v573_v31 = vmul.f32 0.35355338, %v569_v30  ;;  %v972_v32 = vpop.f32.mrb[5].mxu1  ;;  %v408_v33 = vsel %vm158_vm1, %v407_v29, -inf }
 0x376   : > { %409 = vmax.xlane.f32.xlu1 %v408_v33 }
 0x377   : > { %v574_v34 = vadd.f32 %v919_v4, %v573_v31 }
 0x378   : > { %v736_v35 = vpop.f32.mrb[6].mxu1 }
 0x379   : > { %v740_v36 = vmul.f32 0.35355338, %v736_v35  ;;  %v982_v37 = vpop.f32.mrb[7].mxu1  ;;  %v575_v38 = vsel %vm158_vm1, %v574_v34, -inf }
 0x37a   : > { %576 = vmax.xlane.f32.xlu0 %v575_v38 }
 0x37b   : > { %v741_v39 = vadd.f32 %v919_v4, %v740_v36 }
 0x37d   : > { %v742_v40 = vsel %vm158_vm1, %v741_v39, -inf }
 0x37e   : > { %743 = vmax.xlane.f32.xlu1 %v742_v40 }
 0x38f   : > { %419 = vrot.lane.b32.xlu1 %v1089_v1, %s1046_s26 }
 0x403   : > { %v410_v41 = vpop.xlane.xlu1 %409 }
 0x404   : > { %v411_v42 = vsub.f32 %v407_v29, %v410_v41 }
 0x406   : > { %v412_v43 = vmul.f32 1.442695, %v411_v42 }
 0x407   : > { %v577_v44 = vpop.xlane.xlu0 %576 }
 0x408   : > { %1016 = vpow2.f32 %v412_v43  ;;  %v578_v45 = vsub.f32 %v574_v34, %v577_v44 }
 0x40a   : > { %v579_v46 = vmul.f32 1.442695, %v578_v45 }
 0x40b   : > { %v744_v47 = vpop.xlane.xlu1 %743 }
 0x40c   : > { %1018 = vpow2.f32 %v579_v46  ;;  %v745_v48 = vsub.f32 %v741_v39, %v744_v47 }
 0x40e   : > { %v746_v49 = vmul.f32 1.442695, %v745_v48 }
 0x40f   : > { %v420_v50 = vpop.permute.xlu1 %419 }
 0x410   : > { %1020 = vpow2.f32 %v746_v49  ;;  %964 = vmatpush3.msra.mxu0 %v420_v50 }
 0x411   : > { %973 = vmatprep.subr.mxu0 %v1036_v0 }
 0x412   : > { %v1017_v51 = vpop.eup %1016 }
 0x413   : > { %v414_v52 = vsel %vm158_vm1, %v1017_v51, 0.0 }
 0x414   : > { %415 = vadd.xlane.f32.xlu1 %v414_v52 }
 0x416   : > { %v1019_v53 = vpop.eup %1018 }
 0x417   : > { %v581_v54 = vsel %vm158_vm1, %v1019_v53, 0.0 }
 0x418   : > { %582 = vadd.xlane.f32.xlu1 %v581_v54 }
 0x41a   : > { %v1021_v55 = vpop.eup %1020 }
 0x41b   : > { %v748_v56 = vsel %vm158_vm1, %v1021_v55, 0.0 }
 0x41c   : > { %749 = vadd.xlane.f32.xlu0 %v748_v56 }
 0x429   : > { %753 = vrot.lane.b32.xlu1 %v1089_v1, %s1047_s27 }
 0x432   : > { %586 = vrot.lane.b32.xlu0 %v1089_v1, %s1048_s28 }
 0x4a1   : > { %v416_v57 = vpop.xlane.xlu1 %415 }
 0x4a2   : > { %1022 = vrcp.f32 %v416_v57 }
 0x4a5   : > { %v583_v58 = vpop.xlane.xlu1 %582 }
 0x4a6   : > { %1024 = vrcp.f32 %v583_v58 }
 0x4a9   : > { %v750_v59 = vpop.xlane.xlu0 %749  ;;  %v754_v3 = vpop.permute.xlu1 %753 }
 0x4aa   : > { %1026 = vrcp.f32 %v750_v59 }
 0x4ac   : > { %v1023_v60 = vpop.eup %1022 }
 0x4ad   : > { %v418_v61 = vmul.f32 %v1023_v60, %v1017_v51  ;;  %v587_v62 = vpop.permute.xlu0 %586 }
 0x4af   : > { %966 = vmatmul.mubr.msk.f32.vlgmr.msra.gmra.mrb[2].mxu0 %vm158_vm1, %v418_v61 }
 0x4b0   : > { %v1025_v63 = vpop.eup %1024  ;;  %974 = vmatpush3.msra.mxu0 %v587_v62  ;;  %975 = vmatprep.mubr.msk.f32.mxu0 %vm1037_vm0, %v1036_v0 }
 0x4b1   : > { %v585_v2 = vmul.f32 %v1025_v63, %v1019_v53  ;;  %983 = vmatprep.subr.mxu0 %v1036_v0 }
 0x4b3   : > { %976 = vmatmul.mubr.msk.f32.vlgmr.msra.gmra.mrb[4].mxu0 %vm158_vm1, %v585_v2 }
 0x4b4   : > { %v1027_v1 = vpop.eup %1026  ;;  %984 = vmatpush3.msra.mxu0 %v754_v3  ;;  %985 = vmatprep.mubr.msk.f32.mxu0 %vm1037_vm0, %v1036_v0 }
 0x4b5   : > { %v752_v4 = vmul.f32 %v1027_v1, %v1021_v55 }
 0x4b7   : > { %986 = vmatmul.mubr.msk.f32.vlgmr.msra.gmra.mrb[6].mxu0 %vm158_vm1, %v752_v4 }
 0x582   : > { %v491_v5 = vpop.f32.mrb[2].mxu0 }
 0x583   : > { %830 = vrot.lane.b32.xlu1 %v491_v5, %s1049_s29  ;;  %v967_v6 = vpop.f32.mrb[3].mxu0 }
 0x586   : > { %v658_v7 = vpop.f32.mrb[4].mxu0 }
 0x587   : > { %834 = vrot.lane.b32.xlu0 %v658_v7, %s1050_s30  ;;  %v977_v8 = vpop.f32.mrb[5].mxu0 }
 0x58a   : > { %v825_v9 = vpop.f32.mrb[6].mxu0 }
 0x58b   : > { %838 = vrot.lane.b32.xlu1 %v825_v9, %s1051_s3  ;;  %v987_v10 = vpop.f32.mrb[7].mxu0 }
 0x5f5   : > { %v831_v11 = vpop.permute.xlu1 %830 }
 0x5f6   : > { %v841_v0 = vsel %vm158_vm1, %v1127_v24, %v831_v11 }
 0x5f9   : > { %v835_v12 = vpop.permute.xlu0 %834 }
 0x5fa   : > { %v843_v13 = vsel %vm842_vm2, %v841_v0, %v835_v12 }
 0x5fd   : > { %v839_v14 = vpop.permute.xlu1 %838 }
 0x5fe   : > { %v845_v15 = vsel %vm844_vm3, %v843_v13, %v839_v14 }
 0x5ff   : > { %847 = vst.msk [vmem:[%s152_s6] sm:$0xff] %vm846_vm4, %v845_v15 }
 0x600 PF: > { %s12_s9 = sadd.s32 1, %s1034_s9  }
 0x601   : > { %p9_p4 = scmp.ge.s32.totalorder %s12_s9, 4  }
 0x603   :  { %11 = sbr.rel (!%p9_p4) target bundleno = 1 (0x1), region = 61 }

// kernel: _lambda_.17
= control target key start
LH: loop header
LB: loop body
LE: loop exit
PB: predicated region body
PF: predicated region fallthrough
CT: control target
= control target key end

     0   :  { %s581_s12 = smov 0   ;;  %s583_s13 = smov 0   ;;  %s632_s0 = inlined_call_operand.vmem [shape: f32[16,32], index: 0, kind: input, shape index: {}]   ;;  %s633_s1 = inlined_call_operand.vmem [shape: f32[32,64], index: 1, kind: input, shape index: {}]   ;;  %s634_s2 = inlined_call_operand.vmem [shape: f32[1,64], index: 2, kind: input, shape index: {}]   ;;  %s635_s3 = inlined_call_operand.vmem [shape: f32[16,64], index: 3, kind: output, shape index: {}]  }
   0x1   :  { %s585_s14 = smov 0  }
   0x2 LB: > { %s32_s15 = sadd.s32 1, %s552_s13  ;;  %p476_p0 = scmp.ge.s32.totalorder %s556_s14, 1  ;;  %s556_s14 = sphi %s585_s14, %s13_s14   ;;  %s552_s13 = sphi %s583_s13, %s637_s13   ;;  %s548_s12 = sphi %s581_s12, %s636_s12  }
   0x3   : > { %p34_p1 = scmp.ge.s32.totalorder %s32_s15, 2  ;;  %p186_p2 = scmp.lt.s32.totalorder %s556_s14, 3 }
   0x5   : > { %s639_s15 = smov (%p34_p1, %s32_s15), 0  ;;  %p187_p3 = pnand %p476_p0, %p186_p2 }
   0x6   : > { %v259_v0 = vld [vmem:[%s633_s1] sm:$0xff] (!%p187_p3)  ;;  %v260_v1 = vld [vmem:[%s633_s1 + $0x8] sm:$0xff] (!%p187_p3)  ;;  %v261_v2 = vld [vmem:[%s633_s1 + $0x10] sm:$0xff] (!%p187_p3)  ;;  %vm255_vm0 = vcmask (!%p187_p3), 523264   ;;  %v558_v3 = vmov (!%p187_p3), 0.0|0.0   ;;  %v559_v6 = vmov (!%p187_p3), 0.0  }
   0x7   : > { %190 = sbr.rel (%p187_p3) target bundleno = 268 (0x10c), region = 32  ;;  %499 = vmatprep.subr.bf16.mxu0 (!%p187_p3), %v558_v3  ;;  %v500_v4 = vpack.c.bf16 (!%p187_p3), %v260_v1, %v259_v0  ;;  %v262_v5 = vld [vmem:[%s633_s1 + $0x18] sm:$0xff] (!%p187_p3)  ;;  %256 = vst.msk [vmem:[#allocation2] sm:$0xff] (!%p187_p3), %vm255_vm0, %v559_v6  ;;  %p225_p4 = scmp.lt.s32.totalorder (!%p187_p3), %s548_s12, 1  ;;  %vm560_vm1 = vmmov (!%p187_p3), 0   ;;  %vm263_vm2 = vcmask (!%p187_p3), 261120  }
   0x8   : > { %496 = vmatprep.mubr.msk.f32.mxu0 (!%p187_p3), %vm560_vm1, %v559_v6  ;;  %v503_v7 = vpack.c.bf16 (!%p187_p3), %v262_v5, %v261_v2  ;;  %v480_v13 = vld [vmem:[%s634_s2] ss:$0 sm:$0xff] (!%p187_p3) }
   0x9   : > { %501 = vmatpush3.bf16.msra.mxu0 (!%p187_p3), %v500_v4 }
   0xa   : > { %502 = vmatprep.subr.bf16.mxu0 (!%p187_p3), %v558_v3 }
   0xd   : > { %504 = vmatpush3.bf16.msra.mxu0 (!%p187_p3), %v503_v7 }
   0xe   : > { %s641_s12 = smov (!%p225_p4, %s548_s12), 1  ;;  %v257_v9 = vld [vmem:[#allocation2] sm:$0xff] }
   0xf   : > { %s477_s24 = sshll.u32 %s641_s12, 3 }
  0x10   : > { %s231_s27 = scalar_lea.vmem %s632_s0, %s477_s24  ;;  %s250_s5 = scalar_lea.vmem %s635_s3, %s477_s24 }
  0x11   : > { %v258_v8 = vld [vmem:[%s231_s27] sm:$0xff] }
  0x12   : > { %497 = vmatmul.mubr.msk.f32.vlgmr.msra.gmra.mrb[0].mxu0 %vm263_vm2, %v258_v8 }
  0xe5   : > { %v333_v10 = vpop.f32.mrb[0].mxu0 }
  0xe6   : > { %v337_v11 = vadd.f32 %v333_v10, %v257_v9  ;;  %v498_v12 = vpop.f32.mrb[1].mxu0 }
  0xe8   : > { %339 = vst.msk [vmem:[#allocation2] sm:$0xff] %vm255_vm0, %v337_v11 }
  0xef   : > { %v343_v14 = vld [vmem:[#allocation2] sm:$0xff] }
  0xf0   : > { %v351_v15 = vadd.f32 %v480_v13, %v343_v14 }
  0xf2   : > { %v353_v16 = vmul.f32 0.044715, %v351_v15  ;;  %v352_v22 = vmul.f32 0.5, %v351_v15 }
  0xf4   : > { %v354_v17 = vmul.f32 %v353_v16, %v351_v15 }
  0xf6   : > { %v355_v18 = vmul.f32 %v354_v17, %v351_v15 }
  0xf8   : > { %v356_v19 = vadd.f32 %v355_v18, %v351_v15 }
  0xfa   : > { %v357_v20 = vmul.f32 0.7978846, %v356_v19 }
  0xfc   : > { %532 = vtanh.f32 %v357_v20 }
 0x106   : > { %v533_v21 = vpop.eup %532 }
 0x107   : > { %v359_v23 = vadd.f32 1.0, %v533_v21 }
 0x109   : > { %v360_v24 = vmul.f32 %v359_v23, %v352_v22 }
 0x10b   : > { %361 = vst.msk [vmem:[%s250_s5] sm:$0xff] %vm255_vm0, %v360_v24 }
 0x10c PF: > { %s13_s14 = sadd.s32 1, %s556_s14   ;;  %s636_s12 = smov %s552_s13 }
 0x10d   : > { %p10_p5 = scmp.ge.s32.totalorder %s13_s14, 4   ;;  %s637_s13 = smov %s639_s15 }
 0x10f   :  { %12 = sbr.rel (!%p10_p5) target bundleno = 2 (0x2), region = 76 }

// kernel: _lambda_.18
= control target key start
LH: loop header
LB: loop body
LE: loop exit
PB: predicated region body
PF: predicated region fallthrough
CT: control target
= control target key end

     0   :  { %s685_s21 = smov 0   ;;  %s687_s22 = smov 0   ;;  %s764_s0 = inlined_call_operand.vmem [shape: f32[16,64], index: 0, kind: input, shape index: {}]   ;;  %s765_s1 = inlined_call_operand.vmem [shape: f32[64,32], index: 1, kind: input, shape index: {}]   ;;  %s766_s2 = inlined_call_operand.vmem [shape: f32[1,32], index: 2, kind: input, shape index: {}]   ;;  %s767_s3 = inlined_call_operand.vmem [shape: f32[16,32], index: 3, kind: input, shape index: {}]   ;;  %s768_s4 = inlined_call_operand.vmem [shape: f32[1,32], index: 4, kind: input, shape index: {}]   ;;  %s769_s5 = inlined_call_operand.vmem [shape: f32[1,32], index: 5, kind: input, shape index: {}]   ;;  %s770_s6 = inlined_call_operand.vmem [shape: f32[16,32], index: 6, kind: output, shape index: {}]  }
   0x1   :  { %s689_s23 = smov 0  }
   0x2 LB: > { %s28_s24 = sadd.s32 1, %s641_s22  ;;  %p544_p0 = scmp.ge.s32.totalorder %s645_s23, 1  ;;  %s645_s23 = sphi %s689_s23, %s16_s23   ;;  %s641_s22 = sphi %s687_s22, %s772_s22   ;;  %s637_s21 = sphi %s685_s21, %s771_s21  }
   0x3   : > { %p30_p1 = scmp.ge.s32.totalorder %s28_s24, 2  ;;  %p248_p2 = scmp.lt.s32.totalorder %s645_s23, 3 }
   0x5   : > { %s774_s24 = smov (%p30_p1, %s28_s24), 0  ;;  %p249_p3 = pnand %p544_p0, %p248_p2 }
   0x6   : > { %v317_v0 = vld [vmem:[%s765_s1] sm:$0xff] (!%p249_p3)  ;;  %v318_v1 = vld [vmem:[%s765_s1 + $0x8] sm:$0xff] (!%p249_p3)  ;;  %v319_v2 = vld [vmem:[%s765_s1 + $0x10] sm:$0xff] (!%p249_p3)  ;;  %vm313_vm0 = vcmask (!%p249_p3), 261120   ;;  %v647_v3 = vmov (!%p249_p3), 0.0|0.0   ;;  %v648_v6 = vmov (!%p249_p3), 0.0  }
   0x7   : > { %252 = sbr.rel (%p249_p3) target bundleno = 564 (0x234), region = 44  ;;  %582 = vmatprep.subr.bf16.mxu0 (!%p249_p3), %v647_v3  ;;  %v583_v4 = vpack.c.bf16 (!%p249_p3), %v318_v1, %v317_v0  ;;  %v320_v5 = vld [vmem:[%s765_s1 + $0x18] sm:$0xff] (!%p249_p3)  ;;  %314 = vst.msk [vmem:[#allocation2] sm:$0xff] (!%p249_p3), %vm313_vm0, %v648_v6  ;;  %p288_p4 = scmp.lt.s32.totalorder (!%p249_p3), %s637_s21, 1  ;;  %vm649_vm1 = vmmov (!%p249_p3), 0   ;;  %v321_v8 = vld [vmem:[%s765_s1 + $0x20] sm:$0xff] (!%p249_p3) }
   0x8   : > { %579 = vmatprep.mubr.msk.f32.mxu0 (!%p249_p3), %vm649_vm1, %v648_v6  ;;  %v586_v7 = vpack.c.bf16 (!%p249_p3), %v320_v5, %v319_v2  ;;  %v322_v9 = vld [vmem:[%s765_s1 + $0x28] sm:$0xff] (!%p249_p3)  ;;  %v323_v11 = vld [vmem:[%s765_s1 + $0x30] sm:$0xff] (!%p249_p3)  ;;  %v324_v12 = vld [vmem:[%s765_s1 + $0x38] sm:$0xff] (!%p249_p3)  ;;  %vm325_vm2 = vcmask (!%p249_p3), 523264  }
   0x9   : > { %584 = vmatpush3.bf16.msra.mxu0 (!%p249_p3), %v583_v4  ;;  %v589_v10 = vpack.c.bf16 (!%p249_p3), %v322_v9, %v321_v8  ;;  %v592_v13 = vpack.c.bf16 (!%p249_p3), %v324_v12, %v323_v11  ;;  %v549_v19 = vld [vmem:[%s766_s2] ss:$0 sm:$0xff] (!%p249_p3) }
   0xa   : > { %585 = vmatprep.subr.bf16.mxu0 (!%p249_p3), %v647_v3  ;;  %v550_v34 = vld [vmem:[%s768_s4] ss:$0 sm:$0xff] (!%p249_p3) }
   0xb   : > { %v551_v36 = vld [vmem:[%s769_s5] ss:$0 sm:$0xff] (!%p249_p3) }
   0xd   : > { %587 = vmatpush3.bf16.msra.mxu0 (!%p249_p3), %v586_v7 }
   0xe   : > { %s776_s21 = smov (!%p288_p4, %s637_s21), 1  ;;  %588 = vmatprep.subr.bf16.mxu0 %v647_v3  ;;  %v315_v15 = vld [vmem:[#allocation2] sm:$0xff] }
   0xf   : > { %s728_s17 = sshll.u32 %s776_s21, 3 }
  0x10   : > { %s294_s20 = scalar_lea.vmem %s764_s0, %s728_s17  ;;  %s304_s26 = scalar_lea.vmem %s767_s3, %s728_s17 }
  0x11   : > { %590 = vmatpush3.bf16.msra.mxu0 %v589_v10  ;;  %v316_v14 = vld [vmem:[%s294_s20] sm:$0xff]  ;;  %s308_s11 = scalar_lea.vmem %s770_s6, %s728_s17 }
  0x12   : > { %591 = vmatprep.subr.bf16.mxu0 %v647_v3  ;;  %v414_v21 = vld [vmem:[%s304_s26] sm:$0xff] }
  0x15   : > { %593 = vmatpush3.bf16.msra.mxu0 %v592_v13 }
  0x18   : > { %580 = vmatmul.mubr.msk.f32.vlgmr.msra.gmra.mrb[0].mxu0 %vm325_vm2, %v316_v14 }
  0xeb   : > { %v395_v16 = vpop.f32.mrb[0].mxu0 }
  0xec   : > { %v399_v17 = vadd.f32 %v395_v16, %v315_v15  ;;  %v581_v18 = vpop.f32.mrb[1].mxu0 }
  0xee   : > { %401 = vst.msk [vmem:[#allocation2] sm:$0xff] %vm313_vm0, %v399_v17 }
  0xf5   : > { %v405_v20 = vld [vmem:[#allocation2] sm:$0xff] }
  0xf6   : > { %v413_v22 = vadd.f32 %v549_v19, %v405_v20 }
  0xf8   : > { %v415_v23 = vadd.f32 %v414_v21, %v413_v22 }
  0xfa   : > { %v416_v24 = vsel %vm313_vm0, %v415_v23, 0.0 }
  0xfb   : > { %417 = vadd.xlane.f32.xlu0 %v416_v24 }
 0x188   : > { %v418_v25 = vpop.xlane.xlu0 %417 }
 0x189   : > { %v420_v26 = vmul.f32 0.03125, %v418_v25 }
 0x18b   : > { %v421_v27 = vsub.f32 %v415_v23, %v420_v26 }
 0x18d   : > { %v422_v28 = vmul.f32 %v421_v27, %v421_v27 }
 0x18f   : > { %v423_v29 = vsel %vm313_vm0, %v422_v28, 0.0 }
 0x190   : > { %424 = vadd.xlane.f32.xlu0 %v423_v29 }
 0x21d   : > { %v425_v30 = vpop.xlane.xlu0 %424 }
 0x21e   : > { %v426_v31 = vmul.f32 0.03125, %v425_v30 }
 0x220   : > { %v427_v32 = vadd.f32 1e-12, %v426_v31 }
 0x222   : > { %621 = vrsqrt.f32 %v427_v32 }
 0x22c   : > { %v622_v33 = vpop.eup %621 }
 0x22d   : > { %v429_v35 = vmul.f32 %v622_v33, %v421_v27 }
 0x22f   : > { %v437_v37 = vmul.f32 %v550_v34, %v429_v35 }
 0x231   : > { %v445_v38 = vadd.f32 %v551_v36, %v437_v37 }
 0x233   : > { %446 = vst.msk [vmem:[%s308_s11] sm:$0xff] %vm313_vm0, %v445_v38 }
 0x234 PF: > { %s16_s23 = sadd.s32 1, %s645_s23   ;;  %s771_s21 = smov %s641_s22 }
 0x235   : > { %p13_p5 = scmp.ge.s32.totalorder %s16_s23, 4   ;;  %s772_s22 = smov %s774_s24 }
 0x237   :  { %15 = sbr.rel (!%p13_p5) target bundleno = 2 (0x2), region = 88 }

// kernel: _lambda_.25
= control target key start
LH: loop header
LB: loop body
LE: loop exit
PB: predicated region body
PF: predicated region fallthrough
CT: control target
= control target key end

     0   :  { %18 = vsyncpa [#allocation3], 0  ;;  %v670_v3 = vmov 0.0|0.0   ;;  %vm671_vm0 = vmmov 0   ;;  %v672_v6 = vmov 0.0   ;;  %s869_s0 = inlined_call_operand.vmem [shape: f32[2,32], index: 0, kind: input, shape index: {}]   ;;  %s870_s1 = inlined_call_operand.vmem [shape: f32[32,32], index: 1, kind: input, shape index: {}]   ;;  %s871_s2 = inlined_call_operand.vmem [shape: f32[1,32], index: 2, kind: input, shape index: {}]   ;;  %s872_s3 = inlined_call_operand.vmem [shape: f32[32,32], index: 3, kind: input, shape index: {}]   ;;  %s873_s4 = inlined_call_operand.vmem [shape: f32[1,32], index: 4, kind: input, shape index: {}]   ;;  %s874_s5 = inlined_call_operand.vmem [shape: f32[32,6], index: 5, kind: input, shape index: {}]   ;;  %s875_s6 = inlined_call_operand.vmem [shape: f32[1,6], index: 6, kind: input, shape index: {}]   ;;  %s876_s7 = inlined_call_operand.vmem [shape: f32[32,32], index: 7, kind: input, shape index: {}]   ;;  %s877_s8 = inlined_call_operand.vmem [shape: f32[1,32], index: 8, kind: input, shape index: {}]   ;;  %s878_s9 = inlined_call_operand.vmem [shape: f32[32,6], index: 9, kind: input, shape index: {}]   ;;  %s879_s10 = inlined_call_operand.vmem [shape: f32[1,6], index: 10, kind: input, shape index: {}]   ;;  %s880_s11 = inlined_call_operand.hbm [shape: f32[2,6], index: 11, kind: output, shape index: {0}]   ;;  %s881_s12 = inlined_call_operand.hbm [shape: f32[2,6], index: 12, kind: output, shape index: {1}]  }
   0x1   :  { %v43_v0 = vld [vmem:[%s870_s1] sm:$0xff]  ;;  %v44_v1 = vld [vmem:[%s870_s1 + $0x8] sm:$0xff]  ;;  %v45_v2 = vld [vmem:[%s870_s1 + $0x10] sm:$0xff]  ;;  %585 = vmatprep.subr.bf16.mxu0 %v670_v3  ;;  %538 = vmatprep.mubr.msk.f32.mxu0 %vm671_vm0, %v672_v6 }
   0x2   :  { %v586_v4 = vpack.c.bf16 %v44_v1, %v43_v0  ;;  %v46_v5 = vld [vmem:[%s870_s1 + $0x18] sm:$0xff]  ;;  %v129_v7 = vld [vmem:[%s872_s3] sm:$0xff]  ;;  %591 = vmatprep.subr.bf16.mxu1 %v670_v3  ;;  %v130_v8 = vld [vmem:[%s872_s3 + $0x8] sm:$0xff]  ;;  %549 = vmatprep.mubr.msk.f32.mxu1 %vm671_vm0, %v672_v6 }
   0x3   :  { %19 = vsyncpa [#allocation5], 0  ;;  %v589_v9 = vpack.c.bf16 %v46_v5, %v45_v2  ;;  %v592_v10 = vpack.c.bf16 %v130_v8, %v129_v7  ;;  %v42_v11 = vld [vmem:[%s869_s0] sm:$0x3]  ;;  %vm54_vm1 = vcmask 261120   ;;  %v131_v12 = vld [vmem:[%s872_s3 + $0x10] sm:$0xff] }
   0x4   :  { %587 = vmatpush3.bf16.msra.mxu0 %v586_v4  ;;  %v132_v13 = vld [vmem:[%s872_s3 + $0x18] sm:$0xff]  ;;  %v214_v15 = vld [vmem:[%s874_s5] sm:$0xff]  ;;  %v215_v16 = vld [vmem:[%s874_s5 + $0x8] sm:$0xff]  ;;  %vm298_vm2 = vcmask 41984  }
   0x5   :  { %588 = vmatprep.subr.bf16.mxu0 %v670_v3  ;;  %593 = vmatpush3.bf16.msra.mxu1 %v592_v10  ;;  %v595_v14 = vpack.c.bf16 %v132_v13, %v131_v12  ;;  %v598_v17 = vpack.c.bf16 %v215_v16, %v214_v15  ;;  %v495_v18 = vld [vmem:[%s871_s2] ss:$0 sm:$0xff]  ;;  %v301_v20 = vld [vmem:[%s876_s7 + $0x8] sm:$0xff]  ;;  %v302_v26 = vld [vmem:[%s876_s7 + $0x10] sm:$0xff] }
   0x6   :  { %594 = vmatprep.subr.bf16.mxu1 %v670_v3  ;;  %v300_v19 = vld [vmem:[%s876_s7] sm:$0xff]  ;;  %v303_v27 = vld [vmem:[%s876_s7 + $0x18] sm:$0xff]  ;;  %v216_v29 = vld [vmem:[%s874_s5 + $0x10] sm:$0xff] }
   0x7   :  { %v604_v24 = vpack.c.bf16 %v301_v20, %v300_v19  ;;  %v607_v28 = vpack.c.bf16 %v303_v27, %v302_v26  ;;  %v217_v30 = vld [vmem:[%s874_s5 + $0x18] sm:$0xff]  ;;  %v497_v32 = vld [vmem:[%s873_s4] ss:$0 sm:$0xff]  ;;  %v383_v34 = vld [vmem:[%s878_s9 + $0x8] sm:$0xff] }
   0x8   :  { %590 = vmatpush3.bf16.msra.mxu0 %v589_v9  ;;  %v601_v31 = vpack.c.bf16 %v217_v30, %v216_v29  ;;  %v382_v33 = vld [vmem:[%s878_s9] sm:$0xff]  ;;  %v384_v40 = vld [vmem:[%s878_s9 + $0x10] sm:$0xff]  ;;  %v385_v41 = vld [vmem:[%s878_s9 + $0x18] sm:$0xff] }
   0x9   :  { %597 = vmatprep.subr.bf16.mxu0 %v670_v3  ;;  %596 = vmatpush3.bf16.msra.mxu1 %v595_v14  ;;  %v610_v38 = vpack.c.bf16 %v383_v34, %v382_v33  ;;  %v501_v42 = vld [vmem:[%s877_s8] ss:$0 sm:$0xff]  ;;  %v613_v43 = vpack.c.bf16 %v385_v41, %v384_v40  ;;  %s673_s8 = smov [#allocation2]  }
   0xa   :  { %603 = vmatprep.subr.bf16.mxu1 %v670_v3  ;;  %v499_v48 = vld [vmem:[%s875_s6] ss:$0 sm:$0xff]  ;;  %s473_s3 = sshll.u32 %s673_s8, 4  ;;  %s474_s3 = int_to_ptr.vmem [resolvable:$true] %s473_s3 }
   0xb   :  { %539 = vmatmul.mubr.msk.f32.vlgmr.msra.gmra.mrb[0].mxu0 %vm54_vm1, %v42_v11  ;;  %s622_s25 = scalar_lea.vmem %s474_s3, 32  ;;  %p627_p1 = scmp.lt.s32.totalorder %s474_s3, %s474_s3 }
   0xc   :  { %560 = vmatprep.mubr.msk.f32.mxu0 %vm671_vm0, %v672_v6  ;;  %599 = vmatpush3.bf16.msra.mxu0 %v598_v17  ;;  %p623_p0 = scmp.ne.s32.totalorder %s474_s3, %s622_s25  ;;  %p628_p2 = scmp.lt.s32.totalorder %s622_s25, %s622_s25 }
   0xd   :  { %600 = vmatprep.subr.bf16.mxu0 %v670_v3 }
   0xe   :  { %p629_p3 = por %p628_p2, %p627_p1 }
  0x10   :  { %602 = vmatpush3.bf16.msra.mxu0 %v601_v31  ;;  %p630_p4 = pnand %p629_p3, %p623_p0 }
  0x11   :  { %609 = vmatprep.subr.bf16.mxu0 %v670_v3 }
  0xde   :  { %v124_v21 = vpop.f32.mrb[0].mxu0 }
  0xdf   :  { %v125_v22 = vadd.f32 %v495_v18, %v124_v21  ;;  %v540_v23 = vpop.f32.mrb[1].mxu0 }
  0xe1   :  { %v128_v25 = vmax.f32 %v125_v22, 0.0 }
  0xe3   :  { %550 = vmatmul.mubr.msk.f32.vlgmr.msra.gmra.mrb[0].mxu1 %vm54_vm1, %v128_v25 }
  0xe4   :  { %605 = vmatpush3.bf16.msra.mxu1 %v604_v24  ;;  %571 = vmatprep.mubr.msk.f32.mxu1 %vm671_vm0, %v672_v6 }
  0xe5   :  { %606 = vmatprep.subr.bf16.mxu1 %v670_v3 }
  0xe8   :  { %608 = vmatpush3.bf16.msra.mxu1 %v607_v28 }
  0xeb   :  { %572 = vmatmul.mubr.msk.f32.vlgmr.msra.gmra.mrb[2].mxu1 %vm54_vm1, %v42_v11 }
 0x1b6   :  { %v209_v35 = vpop.f32.mrb[0].mxu1 }
 0x1b7   :  { %v210_v36 = vadd.f32 %v497_v32, %v209_v35  ;;  %v551_v37 = vpop.f32.mrb[1].mxu1 }
 0x1b9   :  { %v213_v39 = vmax.f32 %v210_v36, 0.0 }
 0x1bb   :  { %561 = vmatmul.mubr.msk.f32.vlgmr.msra.gmra.mrb[2].mxu0 %vm54_vm1, %v213_v39 }
 0x1bc   :  { %611 = vmatpush3.bf16.msra.mxu0 %v610_v38  ;;  %582 = vmatprep.mubr.msk.f32.mxu0 %vm671_vm0, %v672_v6 }
 0x1bd   :  { %612 = vmatprep.subr.bf16.mxu0 %v670_v3 }
 0x1be   :  { %v377_v44 = vpop.f32.mrb[2].mxu1 }
 0x1bf   :  { %v378_v45 = vadd.f32 %v501_v42, %v377_v44  ;;  %v573_v46 = vpop.f32.mrb[3].mxu1 }
 0x1c0   :  { %614 = vmatpush3.bf16.msra.mxu0 %v613_v43 }
 0x1c1   :  { %620 = vtanh.f32 %v378_v45 }
 0x1cb   :  { %v621_v47 = vpop.eup %620 }
 0x1cc   :  { %583 = vmatmul.mubr.msk.f32.vlgmr.msra.gmra.mrb[4].mxu0 %vm54_vm1, %v621_v47 }
 0x28e   :  { %v294_v49 = vpop.f32.mrb[2].mxu0 }
 0x28f   :  { %v295_v50 = vadd.f32 %v499_v48, %v294_v49  ;;  %v562_v51 = vpop.f32.mrb[3].mxu0 }
 0x291   :  { %299 = vst.msk [vmem:[#allocation2] sm:$0x3] %vm298_vm2, %v295_v50 }
 0x292   :  { %633 = shalt.err (!%p630_p4)
}
 0x293   :  { %s634_s6 = scalar_lea.hbm %s880_s11, 32 }
 0x294   :  { %p635_p5 = scmp.ne.s32.totalorder %s880_s11, %s634_s6  ;;  %p638_p6 = scmp.lt.u32.totalorder %s634_s6, %s880_s11 }
 0x296   :  { %p640_p7 = pnand %p638_p6, %p635_p5 }
 0x298   :  { %643 = shalt.err (!%p640_p7)
}
 0x299   :  { %476 = dma.vmem_to_hbm [thread:$0]  %s474_s3, 32, %s880_s11, [#allocation3]   ;;  %v503_v52 = vld [vmem:[%s879_s10] ss:$0 sm:$0xff] }
 0x29a   :  { %s674_s7 = smov [#allocation4]  }
 0x29b   :  { %s483_s16 = sshll.u32 %s674_s7, 4  ;;  %s484_s16 = int_to_ptr.vmem [resolvable:$true] %s483_s16 }
 0x29c   :  { %s644_s17 = scalar_lea.vmem %s484_s16, 32  ;;  %p649_p9 = scmp.lt.s32.totalorder %s484_s16, %s484_s16 }
 0x29d   :  { %p645_p8 = scmp.ne.s32.totalorder %s484_s16, %s644_s17  ;;  %p650_p10 = scmp.lt.s32.totalorder %s644_s17, %s644_s17 }
 0x29f   :  { %v462_v53 = vpop.f32.mrb[4].mxu0  ;;  %p651_p11 = por %p650_p10, %p649_p9 }
 0x2a0   :  { %v463_v54 = vadd.f32 %v503_v52, %v462_v53  ;;  %v584_v55 = vpop.f32.mrb[5].mxu0 }
 0x2a1   :  { %p652_p12 = pnand %p651_p11, %p645_p8 }
 0x2a2   :  { %466 = vst.msk [vmem:[#allocation4] sm:$0x3] %vm298_vm2, %v463_v54 }
 0x2a3   :  { %655 = shalt.err (!%p652_p12)
}
 0x2a4   :  { %s656_s19 = scalar_lea.hbm %s881_s12, 32 }
 0x2a5   :  { %p657_p13 = scmp.ne.s32.totalorder %s881_s12, %s656_s19  ;;  %p660_p0 = scmp.lt.u32.totalorder %s656_s19, %s881_s12 }
 0x2a7   :  { %p662_p1 = pnand %p660_p0, %p657_p13 }
 0x2a9   :  { %665 = shalt.err (!%p662_p1)
}
 0x2aa   :  { %486 = dma.vmem_to_hbm [thread:$0]  %s484_s16, 32, %s881_s12, [#allocation5]  }
 0x2ab   :  { %666 = dma.done.wait [#allocation3], 32  }
 0x2ac   :  { %667 = vsyncadd [#allocation3], 4294967264 }
 0x2ad   :  { %668 = dma.done.wait [#allocation5], 32  }
 0x2ae   :  { %669 = vsyncadd [#allocation5], 4294967264 }
 0x2af   :  { %493 = vsyncpa [#allocation3], 1 }
 0x2b0   :  { %494 = vsyncpa [#allocation5], 1 }

// kernel: _lambda_.24
= control target key start
LH: loop header
LB: loop body
LE: loop exit
PB: predicated region body
PF: predicated region fallthrough
CT: control target
= control target key end

     0   :  { %s1244_s29 = smov 0   ;;  %s1394_s0 = inlined_call_operand.vmem [shape: f32[2,8,32], index: 0, kind: input, shape index: {}]   ;;  %s1395_s1 = inlined_call_operand.vmem [shape: f32[2,8,1], index: 1, kind: input, shape index: {}]   ;;  %s1396_s2 = inlined_call_operand.vmem [shape: f32[32,1], index: 2, kind: input, shape index: {}]   ;;  %s1397_s3 = inlined_call_operand.<no memory space> [shape: f32[1,1], index: 3, kind: input, shape index: {}]   ;;  %s1398_s4 = inlined_call_operand.vmem [shape: f32[32,32], index: 4, kind: input, shape index: {}]   ;;  %s1399_s5 = inlined_call_operand.vmem [shape: f32[1,32], index: 5, kind: input, shape index: {}]   ;;  %s1400_s6 = inlined_call_operand.vmem [shape: f32[128,32], index: 6, kind: input, shape index: {}]   ;;  %s1401_s7 = inlined_call_operand.vmem [shape: f32[1,32], index: 7, kind: input, shape index: {}]   ;;  %s1402_s8 = inlined_call_operand.vmem [shape: f32[2,1,32], index: 8, kind: output, shape index: {}]  }
   0x1   :  { %v13_v0 = vstv %s1397_s3 }
   0x2   :  { %14 = vst [vmem:[#allocation2] sm:$0x1] %v13_v0 }
   0x3 LB: > { %s1006_s30 = sadd.s32 4294967295, %s1191_s29   ;;  %p1010_p0 = scmp.ge.s32.totalorder %s1191_s29, 1  ;;  %s1191_s29 = sphi %s1244_s29, %s20_s29  }
   0x4   : > { %p272_p1 = scmp.lt.s32.totalorder %s1191_s29, 3 }
   0x6   : > { %p273_p2 = pnand %p1010_p0, %p272_p1 }
   0x7   : > { %v320_v1 = vld [vmem:[%s1396_s2] sm:$0xff] (!%p273_p2)  ;;  %v321_v2 = vld [vmem:[%s1396_s2 + $0x8] sm:$0xff] (!%p273_p2)  ;;  %v322_v3 = vld [vmem:[%s1396_s2 + $0x10] sm:$0xff] (!%p273_p2)  ;;  %v1193_v4 = vmov (!%p273_p2), 0.0|0.0   ;;  %vm1194_vm0 = vmmov (!%p273_p2), 0   ;;  %v1195_v7 = vmov (!%p273_p2), 0.0  }
   0x8   : > { %276 = sbr.rel (%p273_p2) target bundleno = 1275 (0x4fb), region = 52  ;;  %1126 = vmatprep.subr.bf16.mxu0 (!%p273_p2), %v1193_v4  ;;  %v1127_v5 = vpack.c.bf16 (!%p273_p2), %v321_v2, %v320_v1  ;;  %v323_v6 = vld [vmem:[%s1396_s2 + $0x18] sm:$0xff] (!%p273_p2)  ;;  %1063 = vmatprep.mubr.msk.f32.mxu0 (!%p273_p2), %vm1194_vm0, %v1195_v7  ;;  %p307_p3 = scmp.lt.s32.totalorder (!%p273_p2), %s1006_s30, 1  ;;  %vm331_vm1 = vcmask (!%p273_p2), 261120   ;;  %vm405_vm2 = vcmask (!%p273_p2), 7168   ;;  %v540_v39 = vld [vmem:[%s1398_s4] sm:$0xff] (!%p273_p2) }
   0x9   : > { %1066 = vmatprep.subr.mxu1 (!%p273_p2), %v1195_v7  ;;  %1068 = vmatprep.mubr.msk.f32.mxu1 (!%p273_p2), %vm1194_vm0, %v1195_v7  ;;  %v1130_v8 = vpack.c.bf16 (!%p273_p2), %v323_v6, %v322_v3  ;;  %v1013_v10 = vld [vmem:[#allocation2] ss:$0 sm:$0xff] (!%p273_p2)  ;;  %v541_v40 = vld [vmem:[%s1398_s4 + $0x8] sm:$0xff] (!%p273_p2)  ;;  %vm466_vm3 = vcmask (!%p273_p2), 64512   ;;  %v542_v42 = vld [vmem:[%s1398_s4 + $0x10] sm:$0xff] (!%p273_p2)  ;;  %vm945_vm4 = vcmask (!%p273_p2), 253952  }
   0xa   : > { %1128 = vmatpush3.bf16.msra.mxu0 (!%p273_p2), %v1127_v5  ;;  %v1133_v41 = vpack.c.bf16 (!%p273_p2), %v541_v40, %v540_v39  ;;  %v543_v43 = vld [vmem:[%s1398_s4 + $0x18] sm:$0xff] (!%p273_p2)  ;;  %v632_v46 = vld [vmem:[%s1400_s6] sm:$0xff] (!%p273_p2)  ;;  %v633_v47 = vld [vmem:[%s1400_s6 + $0x8] sm:$0xff] (!%p273_p2) }
   0xb   : > { %1129 = vmatprep.subr.bf16.mxu0 (!%p273_p2), %v1193_v4  ;;  %v1136_v45 = vpack.c.bf16 (!%p273_p2), %v543_v43, %v542_v42  ;;  %v1145_v48 = vpack.c.bf16 (!%p273_p2), %v633_v47, %v632_v46  ;;  %v634_v49 = vld [vmem:[%s1400_s6 + $0x10] sm:$0xff] (!%p273_p2)  ;;  %v635_v50 = vld [vmem:[%s1400_s6 + $0x18] sm:$0xff] (!%p273_p2)  ;;  %v636_v52 = vld [vmem:[%s1400_s6 + $0x20] sm:$0xff] (!%p273_p2) }
   0xc   : > { %v1148_v51 = vpack.c.bf16 (!%p273_p2), %v635_v50, %v634_v49  ;;  %v637_v53 = vld [vmem:[%s1400_s6 + $0x28] sm:$0xff] (!%p273_p2)  ;;  %v638_v54 = vld [vmem:[%s1400_s6 + $0x30] sm:$0xff] (!%p273_p2)  ;;  %v639_v56 = vld [vmem:[%s1400_s6 + $0x38] sm:$0xff] (!%p273_p2) }
   0xd   : > { %v1139_v55 = vpack.c.bf16 (!%p273_p2), %v637_v53, %v636_v52  ;;  %v1142_v57 = vpack.c.bf16 (!%p273_p2), %v639_v56, %v638_v54  ;;  %v864_v62 = vld [vmem:[%s1400_s6 + $0x60] sm:$0xff] (!%p273_p2)  ;;  %v865_v63 = vld [vmem:[%s1400_s6 + $0x68] sm:$0xff] (!%p273_p2)  ;;  %v866_v3 = vld [vmem:[%s1400_s6 + $0x70] sm:$0xff] (!%p273_p2) }
   0xe   : > { %1131 = vmatpush3.bf16.msra.mxu0 (!%p273_p2), %v1130_v8  ;;  %v1157_v1 = vpack.c.bf16 (!%p273_p2), %v865_v63, %v864_v62  ;;  %v867_v5 = vld [vmem:[%s1400_s6 + $0x78] sm:$0xff] (!%p273_p2) }
   0xf   : > { %s1404_s30 = smov (!%p307_p3, %s1006_s30), 1  ;;  %1138 = vmatprep.subr.bf16.mxu0 %v1193_v4 }
  0x10   : > { %s1011_s16 = sshll.u32 %s1404_s30, 3  ;;  %s317_s9 = scalar_lea.vmem %s1402_s8, %s1404_s30 }
  0x11   : > { %s310_s19 = scalar_lea.vmem %s1394_s0, %s1011_s16  ;;  %s314_s23 = scalar_lea.vmem %s1395_s1, %s1011_s16 }
  0x12   : > { %v1279_v9 = vld [vmem:[%s310_s19] sm:$0xff] }
  0x13   : > { %1067 = vmatpush3.msra.mxu1 %v1279_v9  ;;  %1064 = vmatmul.mubr.msk.f32.vlgmr.msra.gmra.mrb[0].mxu0 %vm331_vm1, %v1279_v9  ;;  %v319_v25 = vld [vmem:[%s314_s23] sm:$0xff]  ;;  %v625_v58 = vsel %vm331_vm1, %v1279_v9, -inf  ;;  %v616_v2 = vsel %vm331_vm1, %v1279_v9, 0.0 }
  0x14   : > { %1132 = vmatprep.subr.bf16.mxu1 %v1193_v4  ;;  %1090 = vmatprep.mubr.msk.f32.mxu0 %vm1194_vm0, %v1195_v7  ;;  %v626_v59 = vrot.slane %v625_v58, 4 }
  0x15   : > { %1140 = vmatpush3.bf16.msra.mxu0 %v1139_v55 }
  0x16   : > { %1141 = vmatprep.subr.bf16.mxu0 %v1193_v4  ;;  %v627_v60 = vmax.f32 %v625_v58, %v626_v59 }
  0x18   : > { %v628_v61 = vrot.slane %v627_v60, 2 }
  0x19   : > { %1143 = vmatpush3.bf16.msra.mxu0 %v1142_v57 }
  0x1a   : > { %1150 = vmatprep.subr.bf16.mxu0 %v1193_v4  ;;  %v629_v0 = vmax.f32 %v627_v60, %v628_v61 }
  0xe6   : > { %v401_v11 = vpop.f32.mrb[0].mxu0 }
  0xe7   : > { %v402_v12 = vadd.f32 %v1013_v10, %v401_v11  ;;  %v1065_v13 = vpop.f32.mrb[1].mxu0  ;;  %v630_v10 = vrot.slane %v629_v0, 1  ;;  %v617_v11 = vrot.slane %v616_v2, 4 }
  0xe9   : > { %v406_v14 = vsel %vm405_vm2, %v402_v12, -inf  ;;  %v618_v13 = vadd.f32 %v617_v11, %v616_v2 }
  0xea   : > { %407 = vmax.xlane.f32.xlu0 %v406_v14  ;;  %v544_v14 = vld [vmem:[%s1399_s5] sm:$0x1] }
 0x177   : > { %v408_v15 = vpop.xlane.xlu0 %407 }
 0x178   : > { %v409_v16 = vrot.slane %v408_v15, 4 }
 0x17a   : > { %v410_v17 = vmax.f32 %v408_v15, %v409_v16 }
 0x17c   : > { %v411_v18 = vrot.slane %v410_v17, 2 }
 0x17e   : > { %v412_v19 = vmax.f32 %v410_v17, %v411_v18  ;;  %v619_v18 = vrot.slane %v618_v13, 2 }
 0x180   : > { %v413_v20 = vrot.slane %v412_v19, 1 }
 0x182   : > { %v414_v21 = vmax.f32 %v412_v19, %v413_v20  ;;  %v620_v19 = vadd.f32 %v619_v18, %v618_v13  ;;  %v786_v20 = vld [vmem:[%s1400_s6 + $0x40] sm:$0xff] }
 0x184   : > { %1162 = vpush %v414_v21  ;;  %v787_v21 = vld [vmem:[%s1400_s6 + $0x48] sm:$0xff] }
 0x1b5   : > { %s1163_s20 = spop %1162 }
 0x1b6   : > { %v416_v22 = vstv %s1163_s20 }
 0x1b7   : > { %v417_v23 = vsub.f32 %v402_v12, %v416_v22  ;;  %v1160_v12 = vpack.c.bf16 %v867_v5, %v866_v3  ;;  %v621_v22 = vrot.slane %v620_v19, 1 }
 0x1b9   : > { %v418_v24 = vmul.f32 1.442695, %v417_v23  ;;  %v1151_v23 = vpack.c.bf16 %v787_v21, %v786_v20 }
 0x1bb   : > { %1177 = vpow2.f32 %v418_v24  ;;  %v788_v24 = vld [vmem:[%s1400_s6 + $0x50] sm:$0xff] }
 0x1c5   : > { %v1178_v26 = vpop.eup %1177 }
 0x1c6   : > { %v420_v27 = vmul.f32 %v1178_v26, %v319_v25  ;;  %v789_v25 = vld [vmem:[%s1400_s6 + $0x58] sm:$0xff] }
 0x1c8   : > { %v421_v28 = vsel %vm405_vm2, %v420_v27, 0.0 }
 0x1c9   : > { %422 = vadd.xlane.f32.xlu0 %v421_v28  ;;  %v1154_v28 = vpack.c.bf16 %v789_v25, %v788_v24 }
 0x256   : > { %v423_v29 = vpop.xlane.xlu0 %422 }
 0x257   : > { %v424_v30 = vrot.slane %v423_v29, 4 }
 0x259   : > { %v425_v31 = vadd.f32 %v424_v30, %v423_v29 }
 0x25b   : > { %v426_v32 = vrot.slane %v425_v31, 2 }
 0x25d   : > { %v427_v33 = vadd.f32 %v426_v32, %v425_v31 }
 0x25f   : > { %v428_v34 = vrot.slane %v427_v33, 1 }
 0x261   : > { %v429_v35 = vadd.f32 %v428_v34, %v427_v33 }
 0x263   : > { %1164 = vpush %v429_v35 }
 0x294   : > { %s1165_s24 = spop %1164 }
 0x295   : > { %v431_v36 = vstv %s1165_s24 }
 0x296   : > { %1179 = vrcp.f32 %v431_v36 }
 0x2a0   : > { %v1180_v37 = vpop.eup %1179 }
 0x2a1   : > { %v433_v38 = vmul.f32 %v1180_v37, %v420_v27  ;;  %v622_v27 = vadd.f32 %v621_v22, %v620_v19 }
 0x2a3   : > { %434 = vxpose.xlu1.b32.start.end [1/1] (short) (narrow) %v433_v38, 8  ;;  %v624_v29 = vmul.f32 0.125, %v622_v27 }
 0x323   : > { %v450_v44 = vpop.trf.xlu1 }
 0x324   : > { %1069 = vmatmul.mubr.msk.f32.vlgmr.msra.gmra.mrb[0].mxu1 %vm466_vm3, %v450_v44 }
 0x325   : > { %1134 = vmatpush3.bf16.msra.mxu1 %v1133_v41  ;;  %1079 = vmatprep.mubr.msk.f32.mxu1 %vm1194_vm0, %v1195_v7 }
 0x326   : > { %1135 = vmatprep.subr.bf16.mxu1 %v1193_v4 }
 0x329   : > { %1137 = vmatpush3.bf16.msra.mxu1 %v1136_v45 }
 0x32a   : > { %1144 = vmatprep.subr.bf16.mxu1 %v1193_v4 }
 0x32c   : > { %1080 = vmatmul.mubr.msk.f32.vlgmr.msra.gmra.mrb[2].mxu1 %vm331_vm1, %v1279_v9  ;;  %v631_v9 = vmax.f32 %v629_v0, %v630_v10 }
 0x32d   : > { %1146 = vmatpush3.bf16.msra.mxu1 %v1145_v48  ;;  %1101 = vmatprep.mubr.msk.f32.mxu1 %vm1194_vm0, %v1195_v7 }
 0x32e   : > { %1147 = vmatprep.subr.bf16.mxu1 %v1193_v4 }
 0x331   : > { %1149 = vmatpush3.bf16.msra.mxu1 %v1148_v51 }
 0x332   : > { %1156 = vmatprep.subr.bf16.mxu1 %v1193_v4 }
 0x3f7   : > { %v536_v6 = vpop.f32.mrb[0].mxu1 }
 0x3f8   : > { %v1070_v8 = vpop.f32.mrb[1].mxu1  ;;  %1102 = vmatmul.mubr.msk.f32.vlgmr.msra.gmra.mrb[4].mxu1 %vm331_vm1, %v536_v6 }
 0x3f9   : > { %1158 = vmatpush3.bf16.msra.mxu1 %v1157_v1  ;;  %1123 = vmatprep.mubr.msk.f32.mxu1 %vm1194_vm0, %v1195_v7 }
 0x3fa   : > { %1159 = vmatprep.subr.bf16.mxu1 %v1193_v4 }
 0x3fd   : > { %1161 = vmatpush3.bf16.msra.mxu1 %v1160_v12 }
 0x3ff   : > { %v611_v15 = vpop.f32.mrb[2].mxu1 }
 0x400   : > { %v612_v16 = vadd.f32 %v611_v15, %v544_v14  ;;  %v1081_v17 = vpop.f32.mrb[3].mxu1  ;;  %1124 = vmatmul.mubr.msk.f32.vlgmr.msra.gmra.mrb[6].mxu1 %vm331_vm1, %v631_v9 }
 0x402   : > { %1181 = vtanh.f32 %v612_v16 }
 0x40c   : > { %v1182_v26 = vpop.eup %1181 }
 0x40d   : > { %1091 = vmatmul.mubr.msk.f32.vlgmr.msra.gmra.mrb[2].mxu0 %vm331_vm1, %v1182_v26 }
 0x40e   : > { %1152 = vmatpush3.bf16.msra.mxu0 %v1151_v23  ;;  %1112 = vmatprep.mubr.msk.f32.mxu0 %vm1194_vm0, %v1195_v7  ;;  %v942_v7 = vld [vmem:[%s1401_s7] sm:$0x1] }
 0x40f   : > { %1153 = vmatprep.subr.bf16.mxu0 %v1193_v4 }
 0x412   : > { %1155 = vmatpush3.bf16.msra.mxu0 %v1154_v28 }
 0x415   : > { %1113 = vmatmul.mubr.msk.f32.vlgmr.msra.gmra.mrb[4].mxu0 %vm331_vm1, %v624_v29 }
 0x4cb   : > { %v782_v30 = vpop.f32.mrb[4].mxu1 }
 0x4cc   : > { %v1103_v31 = vpop.f32.mrb[5].mxu1 }
 0x4d3   : > { %v937_v32 = vpop.f32.mrb[6].mxu1 }
 0x4d4   : > { %v1125_v33 = vpop.f32.mrb[7].mxu1 }
 0x4e0   : > { %v709_v34 = vpop.f32.mrb[2].mxu0 }
 0x4e1   : > { %v783_v35 = vadd.f32 %v782_v30, %v709_v34  ;;  %v1092_v36 = vpop.f32.mrb[3].mxu0 }
 0x4e8   : > { %v859_v37 = vpop.f32.mrb[4].mxu0 }
 0x4e9   : > { %v863_v38 = vadd.f32 %v859_v37, %v783_v35  ;;  %v1114_v39 = vpop.f32.mrb[5].mxu0 }
 0x4eb   : > { %v941_v4 = vadd.f32 %v937_v32, %v863_v38 }
 0x4ed   : > { %v943_v40 = vadd.f32 %v942_v7, %v941_v4 }
 0x4ef   : > { %1183 = vtanh.f32 %v943_v40 }
 0x4f9   : > { %v1184_v41 = vpop.eup %1183 }
 0x4fa   : > { %946 = vst.msk [vmem:[%s317_s9] sm:$0x1] %vm945_vm4, %v1184_v41 }
 0x4fb PF: > { %s20_s29 = sadd.s32 1, %s1191_s29  }
 0x4fc   : > { %p17_p4 = scmp.ge.s32.totalorder %s20_s29, 4  }
 0x4fe   :  { %19 = sbr.rel (!%p17_p4) target bundleno = 3 (0x3), region = 85 }

</bundles_post_ra>
